<compile_context>
chip_gen: v7x
topology: tpu7x:2x2x1
jax: 0.10.0
libtpu: 0.0.40
codegen_flags: <defaults>
</compile_context>

<pallas_src>
import functools

import jax
import jax.numpy as jnp
from jax.experimental import pallas as pl
from jax.experimental.pallas import tpu as pltpu


# ----------------------------------------------------------------------------
# Fused kernel (one grid step == one batch tile)
# ----------------------------------------------------------------------------

def _gmsdr_fused_kernel(
    x_ref,      # (1, N, BT*C) f32   batch-tile slab, node-major, cols = (bt, c)
    hx_ref,     # (BT, K, N*D) f32   lane-dense hidden-state window
    sup_ref,    # (S, N, N)    bf16  stacked supports (pinned)
    nv1_ref,    # (N, r)       f32   nodevec1 (pinned)
    nv2_ref,    # (r, N)       f32   nodevec2 (pinned)
    wperm_ref,  # (M, C, D)    bf16  gconv weight, pre-permuted (pinned)
    gb_ref,     # (1, D)       f32   gconv bias
    W_ref,      # (D, D)       f32
    b_ref,      # (N, D)       f32
    R_ref,      # (K, N*D)     f32
    attw_ref,   # (1, N*D)     f32   attention weight (lane-dense row)
    attb_ref,   # (1,)         f32   attention bias (SMEM scalar)
    out_ref,    # (BT, 1, N*D) f32   lane-dense output tile
    hxnew_ref,  # (BT, K, N*D) f32   shifted window (aliased onto hx_k)
    *,
    num_supports,
    max_step,
    pre_k,
    num_nodes,
    num_units,
    batch_tile,
    feat_size,
):
    f32 = jnp.float32
    bf16 = jnp.bfloat16
    N, D, C, BT, K = num_nodes, num_units, feat_size, batch_tile, pre_k
    num_matrices = (num_supports + 1) * max_step + 1

    # ---- adaptive adjacency: softmax(relu(nodevec1 @ nodevec2), axis=1) ----
    # Tiny f32 matmul + exact softmax (no approx reciprocal, so adjacency rows
    # sum to 1 like the PyTorch reference).
    mat = jnp.dot(nv1_ref[...], nv2_ref[...], preferred_element_type=f32)
    mat = jnp.maximum(mat, 0.0)
    e = jnp.exp(mat - jnp.max(mat, axis=1, keepdims=True))
    adp = (e / jnp.sum(e, axis=1, keepdims=True)).astype(bf16)

    # ---- batch-folded Chebyshev diffusion + on-the-fly gconv accumulation ----
    # The diffusion state is one (N, BT*C) slab: left-multiplying by an (N, N)
    # matrix acts column-wise, so every batch element / feature column evolves
    # exactly as in the per-batch torch reference.
    def spmm(a_bf16, x):                       # (N, N) @ (N, BT*C), f32 acc
        return jnp.dot(a_bf16, x.astype(bf16), preferred_element_type=f32)

    def proj(x, m):
        # Relayout (N, BT*C) -> (BT*N, C) with bt-major rows so the gconv
        # result lands directly in output order (no final transpose needed).
        rows = jnp.concatenate(
            [x[:, bt * C:(bt + 1) * C] for bt in range(BT)], axis=0)
        return jnp.dot(rows.astype(bf16), wperm_ref[m],
                       preferred_element_type=f32)           # (BT*N, D)

    x0 = x_ref[0]                               # (N, BT*C) f32
    g = proj(x0, 0)                             # gconv accumulator (BT*N, D)
    m_idx = 1
    for s in range(num_supports):
        sup = sup_ref[s]
        x1 = spmm(sup, x0)
        g = g + proj(x1, m_idx)
        m_idx += 1
        for _ in range(2, max_step + 1):
            x2 = 2.0 * spmm(sup, x1) - x0
            g = g + proj(x2, m_idx)
            m_idx += 1
            x1, x0 = x2, x1
    x1 = spmm(adp, x0)
    g = g + proj(x1, m_idx)
    m_idx += 1
    for _ in range(2, max_step + 1):
        x2 = spmm(adp, x1) - x0
        g = g + proj(x2, m_idx)
        m_idx += 1
        x1, x0 = x2, x1
    assert m_idx == num_matrices

    g = g + gb_ref[...]                          # bias_start = 1.0
    conv = jnp.where(g > 0, g, 0.01 * g)         # leaky_relu, slope 0.01

    # ---- conv @ W + b (small matmul; kept f32 for accuracy) ----
    main = jnp.dot(conv, W_ref[...], preferred_element_type=f32)   # (BT*N, D)
    main = main.reshape(BT, N, D) + b_ref[...][None, :, :]
    main = main.reshape(BT, N * D)               # lane-dense (BT, N*D)

    # ---- attention over new_states = hx_k + R on the lane-dense view ----
    ns = hx_ref[...] + R_ref[...][None]                              # (BT,K,ND)
    scores = jnp.sum(ns * attw_ref[...][None], axis=-1) + attb_ref[0]  # (BT,K)
    e_s = jnp.exp(scores - jnp.max(scores, axis=1, keepdims=True))
    w = e_s / jnp.sum(e_s, axis=1, keepdims=True)                    # (BT, K)
    att = jnp.sum(ns * w[:, :, None], axis=1)                        # (BT, ND)

    out_tile = main + att
    out_ref[:, 0, :] = out_tile

    # ---- shifted hidden window: one bulk slab copy + new last row ----
    # (hx_new shares the HBM buffer with hx_k via input_output_aliases.)
    if K > 1:
        hxnew_ref[:, 0:K - 1, :] = hx_ref[:, 1:K, :]
    hxnew_ref[:, K - 1, :] = out_tile


# ----------------------------------------------------------------------------
# Wrapper
# ----------------------------------------------------------------------------

def gmsdr_cell_forward(inputs, hx_k, params, supports, *,
                       max_diffusion_step, pre_v, batch_tile=None):
    # TODO(synk): the max_diffusion_step == 0 path of the original torch code
    # has inconsistent index bookkeeping; keep it asserted out.
    assert max_diffusion_step >= 1
    B, K, N, D = hx_k.shape
    ND = N * D
    input_dim = inputs.shape[1] // N
    S = len(supports)
    M = (S + 1) * max_diffusion_step + 1

    if batch_tile is None:
        batch_tile = B
    BT = batch_tile
    assert B % BT == 0, "batch must be divisible by batch_tile"
    G = B // BT

    # inputs_and_state = concat([inputs, preH(last pre_v hidden states)], -1)
    x_in = inputs.reshape(B, N, input_dim)
    pre_list = [hx_k[:, K - 1 - i] for i in range(pre_v)]
    x_cat = jnp.concatenate([x_in] + pre_list, axis=-1)            # (B, N, C)
    C = x_cat.shape[-1]

    # Node-major batch-folded slabs, one per batch tile: (G, N, BT*C).
    x_slab = (x_cat.reshape(G, BT, N, C)
              .transpose(0, 2, 1, 3)
              .reshape(G, N, BT * C))

    # Lane-dense hidden window / parameters.
    hx_flat = hx_k.reshape(B, K, ND)
    supports_bf16 = jnp.stack(supports, axis=0).astype(jnp.bfloat16)  # (S,N,N)
    # gconv weight row index is c*M + m -> pre-permute once to (M, C, D).
    wperm = (params["gconv_w"].reshape(C, M, D)
             .transpose(1, 0, 2)
             .astype(jnp.bfloat16))
    gb = params["gconv_b"].reshape(1, D)
    R_flat = params["R"].reshape(K, ND)
    attw = params["att_w"].reshape(1, ND)
    attb = params["att_b"].reshape(1)

    kernel = functools.partial(
        _gmsdr_fused_kernel,
        num_supports=S,
        max_step=max_diffusion_step,
        pre_k=K,
        num_nodes=N,
        num_units=D,
        batch_tile=BT,
        feat_size=C,
    )

    r1 = params["nodevec1"].shape[1]
    smem = pltpu.MemorySpace.SMEM

    out3, hx_new = pl.pallas_call(
        kernel,
        grid=(G,),
        in_specs=[
            pl.BlockSpec((1, N, BT * C), lambda i: (i, 0, 0)),   # x slab tile
            pl.BlockSpec((BT, K, ND), lambda i: (i, 0, 0)),      # hx_k tile
            pl.BlockSpec((S, N, N), lambda i: (0, 0, 0)),        # supports
            pl.BlockSpec((N, r1), lambda i: (0, 0)),             # nodevec1
            pl.BlockSpec((r1, N), lambda i: (0, 0)),             # nodevec2
            pl.BlockSpec((M, C, D), lambda i: (0, 0, 0)),        # gconv weight
            pl.BlockSpec((1, D), lambda i: (0, 0)),              # gconv bias
            pl.BlockSpec((D, D), lambda i: (0, 0)),              # W
            pl.BlockSpec((N, D), lambda i: (0, 0)),              # b
            pl.BlockSpec((K, ND), lambda i: (0, 0)),             # R
            pl.BlockSpec((1, ND), lambda i: (0, 0)),             # att_w
            pl.BlockSpec(memory_space=smem),                     # att_b scalar
        ],
        out_specs=(
            pl.BlockSpec((BT, 1, ND), lambda i: (i, 0, 0)),      # out
            pl.BlockSpec((BT, K, ND), lambda i: (i, 0, 0)),      # hx_new
        ),
        out_shape=(
            jax.ShapeDtypeStruct((B, 1, ND), jnp.float32),
            jax.ShapeDtypeStruct((B, K, ND), jnp.float32),
        ),
        # hx_k (input 1) is aliased onto hx_new (output 1): in a multi-step
        # scan the window update becomes in-place instead of re-materialized.
        input_output_aliases={1: 1},
        compiler_params=pltpu.CompilerParams(
            dimension_semantics=("parallel",),   # batch tiles are independent
            vmem_limit_bytes=32 * 1024 * 1024,   # explicit; fits v5e/v6e/v7x
        ),
    )(
        x_slab, hx_flat, supports_bf16,
        params["nodevec1"], params["nodevec2"],
        wperm, gb, params["W"], params["b"], R_flat, attw, attb,
    )

    return out3.reshape(B, ND), hx_new.reshape(B, K, N, D)


# ----------------------------------------------------------------------------
# Pure-JAX reference (mirror of the torch forward) for verification
# ----------------------------------------------------------------------------

def reference_forward(inputs, hx_k, params, supports, max_diffusion_step, pre_v):
    bs, k, n, d = hx_k.shape
    preH = hx_k[:, -1:]
    for i in range(1, pre_v):
        preH = jnp.concatenate([preH, hx_k[:, k - (i + 1):k - i]], axis=-1)
    preH = preH.reshape(bs, n, d * pre_v)
    adp = jax.nn.softmax(jax.nn.relu(params["nodevec1"] @ params["nodevec2"]), axis=1)

    inputs_r = inputs.reshape(bs, n, -1)
    x = jnp.concatenate([inputs_r, preH], axis=2)
    input_size = x.shape[2]
    x0 = x.transpose(1, 2, 0).reshape(n, input_size * bs)
    xs = [x0]
    if max_diffusion_step != 0:
        for support in supports:
            x1 = support @ x0
            xs.append(x1)
            for _ in range(2, max_diffusion_step + 1):
                x2 = 2.0 * (support @ x1) - x0
                xs.append(x2)
                x1, x0 = x2, x1
    x1 = adp @ x0
    xs.append(x1)
    for _ in range(2, max_diffusion_step + 1):
        x2 = adp @ x1 - x0
        xs.append(x2)
        x1, x0 = x2, x1
    num_matrices = (len(supports) + 1) * max_diffusion_step + 1
    xc = jnp.stack(xs, 0).reshape(num_matrices, n, input_size, bs)
    xc = xc.transpose(3, 1, 2, 0).reshape(bs * n, input_size * num_matrices)
    g = xc @ params["gconv_w"] + params["gconv_b"]
    g = g.reshape(bs, n, d)
    conv = jnp.where(g > 0, g, 0.01 * g)   # leaky_relu_, slope 0.01

    new_states = hx_k + params["R"][None]
    xa = new_states.reshape(bs, k, -1)
    sc = xa @ params["att_w"].reshape(-1, 1) + params["att_b"]   # (bs, k, 1)
    w = jax.nn.softmax(sc, axis=1)
    att = (xa * w).sum(axis=1).reshape(bs, n, d)

    out = conv @ params["W"] + params["b"][None] + att
    hx_new = jnp.concatenate([hx_k[:, 1:], out[:, None]], axis=1)
    return out.reshape(bs, n * d), hx_new


# ----------------------------------------------------------------------------
# Main
# ----------------------------------------------------------------------------

if __name__ == "__main__":
    B = 4
    N = 16            # num_nodes
    INPUT_DIM = 4
    D = 32            # num_units (rnn_units)
    PRE_K = 3
    PRE_V = 2
    MAX_DIFF = 2
    NUM_SUPPORTS = 2
    BATCH_TILE = 2    # grid of 2 batch tiles -> "parallel" across v7x cores

    input_size = INPUT_DIM + D * PRE_V
    num_matrices = (NUM_SUPPORTS + 1) * MAX_DIFF + 1

    key = jax.random.PRNGKey(0)
    keys = jax.random.split(key, 12)

    inputs = jax.random.normal(keys[0], (B, N * INPUT_DIM), dtype=jnp.float32)
    hx_k = jax.random.normal(keys[1], (B, PRE_K, N, D), dtype=jnp.float32)

    # synthetic row-normalized supports (random_walk style)
    a = jax.random.uniform(keys[2], (N, N), dtype=jnp.float32) + 0.1
    sup1 = a / jnp.sum(a, axis=1, keepdims=True)
    sup2 = a.T / jnp.sum(a.T, axis=1, keepdims=True)
    supports = [sup1, sup2]

    xavier_std = (2.0 / (input_size * num_matrices + D)) ** 0.5
    # NOTE: module __init__ zero-inits W/b/R; small random values are used here
    # so the kernel is exercised non-trivially (semantics are value-agnostic).
    params = {
        "nodevec1": jax.random.normal(keys[3], (N, 10), dtype=jnp.float32),
        "nodevec2": jax.random.normal(keys[4], (10, N), dtype=jnp.float32),
        "W": 0.1 * jax.random.normal(keys[5], (D, D), dtype=jnp.float32),
        "b": 0.1 * jax.random.normal(keys[6], (N, D), dtype=jnp.float32),
        "R": 0.1 * jax.random.normal(keys[7], (PRE_K, N, D), dtype=jnp.float32),
        "gconv_w": xavier_std * jax.random.normal(
            keys[8], (input_size * num_matrices, D), dtype=jnp.float32),
        "gconv_b": jnp.full((D,), 1.0, dtype=jnp.float32),  # bias_start=1.0
        "att_w": 0.05 * jax.random.normal(keys[9], (N * D,), dtype=jnp.float32),
        "att_b": 0.1 * jax.random.normal(keys[10], (1,), dtype=jnp.float32),
    }

    fwd = jax.jit(functools.partial(
        gmsdr_cell_forward, max_diffusion_step=MAX_DIFF, pre_v=PRE_V,
        batch_tile=BATCH_TILE))

    out_flat, hx_new = fwd(inputs, hx_k, params, supports)
    out_flat = jax.block_until_ready(out_flat)
    hx_new = jax.block_until_ready(hx_new)

    ref_out, ref_hx = reference_forward(inputs, hx_k, params, supports,
                                        MAX_DIFF, PRE_V)

    assert out_flat.shape == (B, N * D)
    assert hx_new.shape == (B, PRE_K, N, D)
    # Tolerance accounts for bf16 MXU operands (f32 accumulation) vs the pure
    # f32 reference, per the performance review's v6e/v7x recommendation.
    assert jnp.allclose(out_flat, ref_out, rtol=1e-2, atol=2e-2), \
        f"output mismatch, max abs err {jnp.max(jnp.abs(out_flat - ref_out))}"
    assert jnp.allclose(hx_new, ref_hx, rtol=1e-2, atol=2e-2), \
        f"hx_k mismatch, max abs err {jnp.max(jnp.abs(hx_new - ref_hx))}"

    print("KERNEL_OK")
</pallas_src>

<mosaic_0001>
module attributes {stable_mosaic.version = 11 : i64} {
  func.func @_gmsdr_fused_kernel(%arg0: i32, %arg1: memref<1x16x136xf32, #tpu.memory_space<vmem>>, %arg2: memref<2x3x512xf32, #tpu.memory_space<vmem>>, %arg3: memref<2x16x16xbf16, #tpu.memory_space<vmem>>, %arg4: memref<16x10xf32, #tpu.memory_space<vmem>>, %arg5: memref<10x16xf32, #tpu.memory_space<vmem>>, %arg6: memref<7x68x32xbf16, #tpu.memory_space<vmem>>, %arg7: memref<1x32xf32, #tpu.memory_space<vmem>>, %arg8: memref<32x32xf32, #tpu.memory_space<vmem>>, %arg9: memref<16x32xf32, #tpu.memory_space<vmem>>, %arg10: memref<3x512xf32, #tpu.memory_space<vmem>>, %arg11: memref<1x512xf32, #tpu.memory_space<vmem>>, %arg12: memref<1xf32, #tpu.memory_space<smem>>, %arg13: memref<2x1x512xf32, #tpu.memory_space<vmem>>, %arg14: memref<2x3x512xf32, #tpu.memory_space<vmem>>) attributes {dimension_semantics = [#tpu.dimension_semantics<parallel>], iteration_bounds = array<i64: 2>, scalar_prefetch = 0 : i64, scratch_operands = 0 : i64, tpu.core_type = #tpu.core_type<tc>, window_params = [{transform_indices = @transform_0, window_bounds = array<i64: 1, 16, 136>}, {transform_indices = @transform_1, window_bounds = array<i64: 2, 3, 512>}, {pipeline_mode = #tpu.pipeline_mode<synchronous>, transform_indices = @transform_2, window_bounds = array<i64: 2, 16, 16>}, {pipeline_mode = #tpu.pipeline_mode<synchronous>, transform_indices = @transform_3, window_bounds = array<i64: 16, 10>}, {pipeline_mode = #tpu.pipeline_mode<synchronous>, transform_indices = @transform_4, window_bounds = array<i64: 10, 16>}, {pipeline_mode = #tpu.pipeline_mode<synchronous>, transform_indices = @transform_5, window_bounds = array<i64: 7, 68, 32>}, {pipeline_mode = #tpu.pipeline_mode<synchronous>, transform_indices = @transform_6, window_bounds = array<i64: 1, 32>}, {pipeline_mode = #tpu.pipeline_mode<synchronous>, transform_indices = @transform_7, window_bounds = array<i64: 32, 32>}, {pipeline_mode = #tpu.pipeline_mode<synchronous>, transform_indices = @transform_8, window_bounds = array<i64: 16, 32>}, {pipeline_mode = #tpu.pipeline_mode<synchronous>, transform_indices = @transform_9, window_bounds = array<i64: 3, 512>}, {pipeline_mode = #tpu.pipeline_mode<synchronous>, transform_indices = @transform_10, window_bounds = array<i64: 1, 512>}, {transform_indices = @transform_11, window_bounds = array<i64: 1>}, {transform_indices = @transform_12, window_bounds = array<i64: 2, 1, 512>}, {transform_indices = @transform_13, window_bounds = array<i64: 2, 3, 512>}]} {
    %c0 = arith.constant 0 : index
    %c0_0 = arith.constant 0 : index
    %0 = vector.load %arg4[%c0, %c0_0] : memref<16x10xf32, #tpu.memory_space<vmem>>, vector<16x10xf32>
    %c0_1 = arith.constant 0 : index
    %c0_2 = arith.constant 0 : index
    %1 = vector.load %arg5[%c0_1, %c0_2] : memref<10x16xf32, #tpu.memory_space<vmem>>, vector<10x16xf32>
    %cst = arith.constant dense<0.000000e+00> : vector<16x16xf32>
    %2 = tpu.matmul %0, %1, %cst {dimension_numbers = #tpu.dot_dimension_numbers<[1], [0], [0], [1], [0, 0, 1, 1], [], []>} : vector<16x10xf32>, vector<10x16xf32>, vector<16x16xf32> -> vector<16x16xf32>
    %cst_3 = arith.constant 0.000000e+00 : f32
    %3 = vector.broadcast %cst_3 : f32 to vector<16x16xf32>
    %4 = arith.maximumf %2, %3 : vector<16x16xf32>
    %cst_4 = arith.constant dense<0xFF800000> : vector<16xf32>
    %5 = vector.multi_reduction <maximumf>, %4, %cst_4 [1] : vector<16x16xf32> to vector<16xf32>
    %6 = vector.shape_cast %5 : vector<16xf32> to vector<16x1xf32>
    %7 = vector.broadcast %6 : vector<16x1xf32> to vector<16x16xf32>
    %8 = arith.subf %4, %7 : vector<16x16xf32>
    %9 = math.exp %8 : vector<16x16xf32>
    %cst_5 = arith.constant dense<0.000000e+00> : vector<16xf32>
    %10 = vector.multi_reduction <add>, %9, %cst_5 [1] : vector<16x16xf32> to vector<16xf32>
    %11 = vector.shape_cast %10 : vector<16xf32> to vector<16x1xf32>
    %12 = vector.broadcast %11 : vector<16x1xf32> to vector<16x16xf32>
    %13 = arith.divf %9, %12 : vector<16x16xf32>
    %14 = arith.truncf %13 : vector<16x16xf32> to vector<16x16xbf16>
    %c0_6 = arith.constant 0 : index
    %c0_7 = arith.constant 0 : index
    %c0_8 = arith.constant 0 : index
    %15 = vector.load %arg1[%c0_6, %c0_7, %c0_8] : memref<1x16x136xf32, #tpu.memory_space<vmem>>, vector<1x16x136xf32>
    %16 = vector.shape_cast %15 : vector<1x16x136xf32> to vector<16x136xf32>
    %17 = vector.extract_strided_slice %16 {offsets = [0, 0], sizes = [16, 68], strides = [1, 1]} : vector<16x136xf32> to vector<16x68xf32>
    %18 = vector.extract_strided_slice %16 {offsets = [0, 68], sizes = [16, 68], strides = [1, 1]} : vector<16x136xf32> to vector<16x68xf32>
    %19 = tpu.concatenate %17, %18 in 0 : vector<16x68xf32>, vector<16x68xf32> -> vector<32x68xf32>
    %20 = arith.truncf %19 : vector<32x68xf32> to vector<32x68xbf16>
    %c0_9 = arith.constant 0 : index
    %c0_10 = arith.constant 0 : index
    %c0_11 = arith.constant 0 : index
    %21 = vector.load %arg6[%c0_9, %c0_10, %c0_11] : memref<7x68x32xbf16, #tpu.memory_space<vmem>>, vector<1x68x32xbf16>
    %22 = vector.shape_cast %21 : vector<1x68x32xbf16> to vector<68x32xbf16>
    %cst_12 = arith.constant dense<0.000000e+00> : vector<32x32xf32>
    %23 = tpu.matmul %20, %22, %cst_12 {dimension_numbers = #tpu.dot_dimension_numbers<[1], [0], [0], [1], [0, 0, 1, 1], [], []>} : vector<32x68xbf16>, vector<68x32xbf16>, vector<32x32xf32> -> vector<32x32xf32>
    %c0_13 = arith.constant 0 : index
    %c0_14 = arith.constant 0 : index
    %c0_15 = arith.constant 0 : index
    %24 = vector.load %arg3[%c0_13, %c0_14, %c0_15] : memref<2x16x16xbf16, #tpu.memory_space<vmem>>, vector<1x16x16xbf16>
    %25 = vector.shape_cast %24 : vector<1x16x16xbf16> to vector<16x16xbf16>
    %26 = arith.truncf %16 : vector<16x136xf32> to vector<16x136xbf16>
    %cst_16 = arith.constant dense<0.000000e+00> : vector<16x136xf32>
    %27 = tpu.matmul %25, %26, %cst_16 {dimension_numbers = #tpu.dot_dimension_numbers<[1], [0], [0], [1], [0, 0, 1, 1], [], []>} : vector<16x16xbf16>, vector<16x136xbf16>, vector<16x136xf32> -> vector<16x136xf32>
    %28 = vector.extract_strided_slice %27 {offsets = [0, 0], sizes = [16, 68], strides = [1, 1]} : vector<16x136xf32> to vector<16x68xf32>
    %29 = vector.extract_strided_slice %27 {offsets = [0, 68], sizes = [16, 68], strides = [1, 1]} : vector<16x136xf32> to vector<16x68xf32>
    %30 = tpu.concatenate %28, %29 in 0 : vector<16x68xf32>, vector<16x68xf32> -> vector<32x68xf32>
    %31 = arith.truncf %30 : vector<32x68xf32> to vector<32x68xbf16>
    %c1 = arith.constant 1 : index
    %c0_17 = arith.constant 0 : index
    %c0_18 = arith.constant 0 : index
    %32 = vector.load %arg6[%c1, %c0_17, %c0_18] : memref<7x68x32xbf16, #tpu.memory_space<vmem>>, vector<1x68x32xbf16>
    %33 = vector.shape_cast %32 : vector<1x68x32xbf16> to vector<68x32xbf16>
    %cst_19 = arith.constant dense<0.000000e+00> : vector<32x32xf32>
    %34 = tpu.matmul %31, %33, %cst_19 {dimension_numbers = #tpu.dot_dimension_numbers<[1], [0], [0], [1], [0, 0, 1, 1], [], []>} : vector<32x68xbf16>, vector<68x32xbf16>, vector<32x32xf32> -> vector<32x32xf32>
    %35 = arith.addf %23, %34 : vector<32x32xf32>
    %36 = arith.truncf %27 : vector<16x136xf32> to vector<16x136xbf16>
    %cst_20 = arith.constant dense<0.000000e+00> : vector<16x136xf32>
    %37 = tpu.matmul %25, %36, %cst_20 {dimension_numbers = #tpu.dot_dimension_numbers<[1], [0], [0], [1], [0, 0, 1, 1], [], []>} : vector<16x16xbf16>, vector<16x136xbf16>, vector<16x136xf32> -> vector<16x136xf32>
    %cst_21 = arith.constant 2.000000e+00 : f32
    %38 = vector.broadcast %cst_21 : f32 to vector<16x136xf32>
    %39 = arith.mulf %38, %37 : vector<16x136xf32>
    %40 = arith.subf %39, %16 : vector<16x136xf32>
    %41 = vector.extract_strided_slice %40 {offsets = [0, 0], sizes = [16, 68], strides = [1, 1]} : vector<16x136xf32> to vector<16x68xf32>
    %42 = vector.extract_strided_slice %40 {offsets = [0, 68], sizes = [16, 68], strides = [1, 1]} : vector<16x136xf32> to vector<16x68xf32>
    %43 = tpu.concatenate %41, %42 in 0 : vector<16x68xf32>, vector<16x68xf32> -> vector<32x68xf32>
    %44 = arith.truncf %43 : vector<32x68xf32> to vector<32x68xbf16>
    %c2 = arith.constant 2 : index
    %c0_22 = arith.constant 0 : index
    %c0_23 = arith.constant 0 : index
    %45 = vector.load %arg6[%c2, %c0_22, %c0_23] : memref<7x68x32xbf16, #tpu.memory_space<vmem>>, vector<1x68x32xbf16>
    %46 = vector.shape_cast %45 : vector<1x68x32xbf16> to vector<68x32xbf16>
    %cst_24 = arith.constant dense<0.000000e+00> : vector<32x32xf32>
    %47 = tpu.matmul %44, %46, %cst_24 {dimension_numbers = #tpu.dot_dimension_numbers<[1], [0], [0], [1], [0, 0, 1, 1], [], []>} : vector<32x68xbf16>, vector<68x32xbf16>, vector<32x32xf32> -> vector<32x32xf32>
    %48 = arith.addf %35, %47 : vector<32x32xf32>
    %c1_25 = arith.constant 1 : index
    %c0_26 = arith.constant 0 : index
    %c0_27 = arith.constant 0 : index
    %49 = vector.load %arg3[%c1_25, %c0_26, %c0_27] : memref<2x16x16xbf16, #tpu.memory_space<vmem>>, vector<1x16x16xbf16>
    %50 = vector.shape_cast %49 : vector<1x16x16xbf16> to vector<16x16xbf16>
    %51 = arith.truncf %27 : vector<16x136xf32> to vector<16x136xbf16>
    %cst_28 = arith.constant dense<0.000000e+00> : vector<16x136xf32>
    %52 = tpu.matmul %50, %51, %cst_28 {dimension_numbers = #tpu.dot_dimension_numbers<[1], [0], [0], [1], [0, 0, 1, 1], [], []>} : vector<16x16xbf16>, vector<16x136xbf16>, vector<16x136xf32> -> vector<16x136xf32>
    %53 = vector.extract_strided_slice %52 {offsets = [0, 0], sizes = [16, 68], strides = [1, 1]} : vector<16x136xf32> to vector<16x68xf32>
    %54 = vector.extract_strided_slice %52 {offsets = [0, 68], sizes = [16, 68], strides = [1, 1]} : vector<16x136xf32> to vector<16x68xf32>
    %55 = tpu.concatenate %53, %54 in 0 : vector<16x68xf32>, vector<16x68xf32> -> vector<32x68xf32>
    %56 = arith.truncf %55 : vector<32x68xf32> to vector<32x68xbf16>
    %c3 = arith.constant 3 : index
    %c0_29 = arith.constant 0 : index
    %c0_30 = arith.constant 0 : index
    %57 = vector.load %arg6[%c3, %c0_29, %c0_30] : memref<7x68x32xbf16, #tpu.memory_space<vmem>>, vector<1x68x32xbf16>
    %58 = vector.shape_cast %57 : vector<1x68x32xbf16> to vector<68x32xbf16>
    %cst_31 = arith.constant dense<0.000000e+00> : vector<32x32xf32>
    %59 = tpu.matmul %56, %58, %cst_31 {dimension_numbers = #tpu.dot_dimension_numbers<[1], [0], [0], [1], [0, 0, 1, 1], [], []>} : vector<32x68xbf16>, vector<68x32xbf16>, vector<32x32xf32> -> vector<32x32xf32>
    %60 = arith.addf %48, %59 : vector<32x32xf32>
    %61 = arith.truncf %52 : vector<16x136xf32> to vector<16x136xbf16>
    %cst_32 = arith.constant dense<0.000000e+00> : vector<16x136xf32>
    %62 = tpu.matmul %50, %61, %cst_32 {dimension_numbers = #tpu.dot_dimension_numbers<[1], [0], [0], [1], [0, 0, 1, 1], [], []>} : vector<16x16xbf16>, vector<16x136xbf16>, vector<16x136xf32> -> vector<16x136xf32>
    %cst_33 = arith.constant 2.000000e+00 : f32
    %63 = vector.broadcast %cst_33 : f32 to vector<16x136xf32>
    %64 = arith.mulf %63, %62 : vector<16x136xf32>
    %65 = arith.subf %64, %27 : vector<16x136xf32>
    %66 = vector.extract_strided_slice %65 {offsets = [0, 0], sizes = [16, 68], strides = [1, 1]} : vector<16x136xf32> to vector<16x68xf32>
    %67 = vector.extract_strided_slice %65 {offsets = [0, 68], sizes = [16, 68], strides = [1, 1]} : vector<16x136xf32> to vector<16x68xf32>
    %68 = tpu.concatenate %66, %67 in 0 : vector<16x68xf32>, vector<16x68xf32> -> vector<32x68xf32>
    %69 = arith.truncf %68 : vector<32x68xf32> to vector<32x68xbf16>
    %c4 = arith.constant 4 : index
    %c0_34 = arith.constant 0 : index
    %c0_35 = arith.constant 0 : index
    %70 = vector.load %arg6[%c4, %c0_34, %c0_35] : memref<7x68x32xbf16, #tpu.memory_space<vmem>>, vector<1x68x32xbf16>
    %71 = vector.shape_cast %70 : vector<1x68x32xbf16> to vector<68x32xbf16>
    %cst_36 = arith.constant dense<0.000000e+00> : vector<32x32xf32>
    %72 = tpu.matmul %69, %71, %cst_36 {dimension_numbers = #tpu.dot_dimension_numbers<[1], [0], [0], [1], [0, 0, 1, 1], [], []>} : vector<32x68xbf16>, vector<68x32xbf16>, vector<32x32xf32> -> vector<32x32xf32>
    %73 = arith.addf %60, %72 : vector<32x32xf32>
    %74 = arith.truncf %52 : vector<16x136xf32> to vector<16x136xbf16>
    %cst_37 = arith.constant dense<0.000000e+00> : vector<16x136xf32>
    %75 = tpu.matmul %14, %74, %cst_37 {dimension_numbers = #tpu.dot_dimension_numbers<[1], [0], [0], [1], [0, 0, 1, 1], [], []>} : vector<16x16xbf16>, vector<16x136xbf16>, vector<16x136xf32> -> vector<16x136xf32>
    %76 = vector.extract_strided_slice %75 {offsets = [0, 0], sizes = [16, 68], strides = [1, 1]} : vector<16x136xf32> to vector<16x68xf32>
    %77 = vector.extract_strided_slice %75 {offsets = [0, 68], sizes = [16, 68], strides = [1, 1]} : vector<16x136xf32> to vector<16x68xf32>
    %78 = tpu.concatenate %76, %77 in 0 : vector<16x68xf32>, vector<16x68xf32> -> vector<32x68xf32>
    %79 = arith.truncf %78 : vector<32x68xf32> to vector<32x68xbf16>
    %c5 = arith.constant 5 : index
    %c0_38 = arith.constant 0 : index
    %c0_39 = arith.constant 0 : index
    %80 = vector.load %arg6[%c5, %c0_38, %c0_39] : memref<7x68x32xbf16, #tpu.memory_space<vmem>>, vector<1x68x32xbf16>
    %81 = vector.shape_cast %80 : vector<1x68x32xbf16> to vector<68x32xbf16>
    %cst_40 = arith.constant dense<0.000000e+00> : vector<32x32xf32>
    %82 = tpu.matmul %79, %81, %cst_40 {dimension_numbers = #tpu.dot_dimension_numbers<[1], [0], [0], [1], [0, 0, 1, 1], [], []>} : vector<32x68xbf16>, vector<68x32xbf16>, vector<32x32xf32> -> vector<32x32xf32>
    %83 = arith.addf %73, %82 : vector<32x32xf32>
    %84 = arith.truncf %75 : vector<16x136xf32> to vector<16x136xbf16>
    %cst_41 = arith.constant dense<0.000000e+00> : vector<16x136xf32>
    %85 = tpu.matmul %14, %84, %cst_41 {dimension_numbers = #tpu.dot_dimension_numbers<[1], [0], [0], [1], [0, 0, 1, 1], [], []>} : vector<16x16xbf16>, vector<16x136xbf16>, vector<16x136xf32> -> vector<16x136xf32>
    %86 = arith.subf %85, %52 : vector<16x136xf32>
    %87 = vector.extract_strided_slice %86 {offsets = [0, 0], sizes = [16, 68], strides = [1, 1]} : vector<16x136xf32> to vector<16x68xf32>
    %88 = vector.extract_strided_slice %86 {offsets = [0, 68], sizes = [16, 68], strides = [1, 1]} : vector<16x136xf32> to vector<16x68xf32>
    %89 = tpu.concatenate %87, %88 in 0 : vector<16x68xf32>, vector<16x68xf32> -> vector<32x68xf32>
    %90 = arith.truncf %89 : vector<32x68xf32> to vector<32x68xbf16>
    %c6 = arith.constant 6 : index
    %c0_42 = arith.constant 0 : index
    %c0_43 = arith.constant 0 : index
    %91 = vector.load %arg6[%c6, %c0_42, %c0_43] : memref<7x68x32xbf16, #tpu.memory_space<vmem>>, vector<1x68x32xbf16>
    %92 = vector.shape_cast %91 : vector<1x68x32xbf16> to vector<68x32xbf16>
    %cst_44 = arith.constant dense<0.000000e+00> : vector<32x32xf32>
    %93 = tpu.matmul %90, %92, %cst_44 {dimension_numbers = #tpu.dot_dimension_numbers<[1], [0], [0], [1], [0, 0, 1, 1], [], []>} : vector<32x68xbf16>, vector<68x32xbf16>, vector<32x32xf32> -> vector<32x32xf32>
    %94 = arith.addf %83, %93 : vector<32x32xf32>
    %c0_45 = arith.constant 0 : index
    %c0_46 = arith.constant 0 : index
    %95 = vector.load %arg7[%c0_45, %c0_46] : memref<1x32xf32, #tpu.memory_space<vmem>>, vector<1x32xf32>
    %96 = vector.broadcast %95 : vector<1x32xf32> to vector<32x32xf32>
    %97 = arith.addf %94, %96 : vector<32x32xf32>
    %cst_47 = arith.constant 0.000000e+00 : f32
    %98 = vector.broadcast %cst_47 : f32 to vector<32x32xf32>
    %99 = arith.cmpf ogt, %97, %98 : vector<32x32xf32>
    %cst_48 = arith.constant 0.00999999977 : f32
    %100 = vector.broadcast %cst_48 : f32 to vector<32x32xf32>
    %101 = arith.mulf %100, %97 : vector<32x32xf32>
    %102 = arith.select %99, %97, %101 : vector<32x32xi1>, vector<32x32xf32>
    %c0_49 = arith.constant 0 : index
    %c0_50 = arith.constant 0 : index
    %103 = vector.load %arg8[%c0_49, %c0_50] : memref<32x32xf32, #tpu.memory_space<vmem>>, vector<32x32xf32>
    %cst_51 = arith.constant dense<0.000000e+00> : vector<32x32xf32>
    %104 = tpu.matmul %102, %103, %cst_51 {dimension_numbers = #tpu.dot_dimension_numbers<[1], [0], [0], [1], [0, 0, 1, 1], [], []>} : vector<32x32xf32>, vector<32x32xf32>, vector<32x32xf32> -> vector<32x32xf32>
    %105 = vector.shape_cast %104 : vector<32x32xf32> to vector<2x16x32xf32>
    %c0_52 = arith.constant 0 : index
    %c0_53 = arith.constant 0 : index
    %106 = vector.load %arg9[%c0_52, %c0_53] : memref<16x32xf32, #tpu.memory_space<vmem>>, vector<16x32xf32>
    %107 = vector.shape_cast %106 : vector<16x32xf32> to vector<1x16x32xf32>
    %108 = vector.broadcast %107 : vector<1x16x32xf32> to vector<2x16x32xf32>
    %109 = arith.addf %105, %108 : vector<2x16x32xf32>
    %110 = vector.shape_cast %109 : vector<2x16x32xf32> to vector<2x512xf32>
    %c0_54 = arith.constant 0 : index
    %c0_55 = arith.constant 0 : index
    %c0_56 = arith.constant 0 : index
    %111 = vector.load %arg2[%c0_54, %c0_55, %c0_56] : memref<2x3x512xf32, #tpu.memory_space<vmem>>, vector<2x3x512xf32>
    %c0_57 = arith.constant 0 : index
    %c0_58 = arith.constant 0 : index
    %112 = vector.load %arg10[%c0_57, %c0_58] : memref<3x512xf32, #tpu.memory_space<vmem>>, vector<3x512xf32>
    %113 = vector.shape_cast %112 : vector<3x512xf32> to vector<1x3x512xf32>
    %114 = vector.broadcast %113 : vector<1x3x512xf32> to vector<2x3x512xf32>
    %115 = arith.addf %111, %114 : vector<2x3x512xf32>
    %c0_59 = arith.constant 0 : index
    %c0_60 = arith.constant 0 : index
    %116 = vector.load %arg11[%c0_59, %c0_60] : memref<1x512xf32, #tpu.memory_space<vmem>>, vector<1x512xf32>
    %117 = vector.shape_cast %116 : vector<1x512xf32> to vector<1x1x512xf32>
    %118 = vector.broadcast %117 : vector<1x1x512xf32> to vector<2x3x512xf32>
    %119 = arith.mulf %115, %118 : vector<2x3x512xf32>
    %cst_61 = arith.constant dense<0.000000e+00> : vector<2x3xf32>
    %120 = vector.multi_reduction <add>, %119, %cst_61 [2] : vector<2x3x512xf32> to vector<2x3xf32>
    %c0_62 = arith.constant 0 : index
    %121 = memref.load %arg12[%c0_62] : memref<1xf32, #tpu.memory_space<smem>>
    %122 = vector.broadcast %121 : f32 to vector<2x3xf32>
    %123 = arith.addf %120, %122 : vector<2x3xf32>
    %cst_63 = arith.constant dense<0xFF800000> : vector<2xf32>
    %124 = vector.multi_reduction <maximumf>, %123, %cst_63 [1] : vector<2x3xf32> to vector<2xf32>
    %125 = vector.shape_cast %124 : vector<2xf32> to vector<2x1xf32>
    %126 = vector.broadcast %125 : vector<2x1xf32> to vector<2x3xf32>
    %127 = arith.subf %123, %126 : vector<2x3xf32>
    %128 = math.exp %127 : vector<2x3xf32>
    %cst_64 = arith.constant dense<0.000000e+00> : vector<2xf32>
    %129 = vector.multi_reduction <add>, %128, %cst_64 [1] : vector<2x3xf32> to vector<2xf32>
    %130 = vector.shape_cast %129 : vector<2xf32> to vector<2x1xf32>
    %131 = vector.broadcast %130 : vector<2x1xf32> to vector<2x3xf32>
    %132 = arith.divf %128, %131 : vector<2x3xf32>
    %133 = vector.shape_cast %132 : vector<2x3xf32> to vector<2x3x1xf32>
    %134 = vector.broadcast %133 : vector<2x3x1xf32> to vector<2x3x512xf32>
    %135 = arith.mulf %115, %134 : vector<2x3x512xf32>
    %cst_65 = arith.constant dense<0.000000e+00> : vector<2x512xf32>
    %136 = vector.multi_reduction <add>, %135, %cst_65 [1] : vector<2x3x512xf32> to vector<2x512xf32>
    %137 = arith.addf %110, %136 : vector<2x512xf32>
    %c0_66 = arith.constant 0 : index
    %c0_67 = arith.constant 0 : index
    %c0_68 = arith.constant 0 : index
    %138 = vector.load %arg13[%c0_66, %c0_67, %c0_68] : memref<2x1x512xf32, #tpu.memory_space<vmem>>, vector<2x1x512xf32>
    %139 = vector.shape_cast %138 : vector<2x1x512xf32> to vector<2x512xf32>
    %140 = vector.shape_cast %137 : vector<2x512xf32> to vector<2x1x512xf32>
    tpu.vector_store %arg13[%c0_66, %c0_67, %c0_68], %140 {strides = array<i32>} : memref<2x1x512xf32, #tpu.memory_space<vmem>>, vector<2x1x512xf32>,
    %c0_69 = arith.constant 0 : index
    %c1_70 = arith.constant 1 : index
    %c0_71 = arith.constant 0 : index
    %141 = vector.load %arg2[%c0_69, %c1_70, %c0_71] : memref<2x3x512xf32, #tpu.memory_space<vmem>>, vector<2x2x512xf32>
    %c0_72 = arith.constant 0 : index
    %c0_73 = arith.constant 0 : index
    %c0_74 = arith.constant 0 : index
    %142 = vector.load %arg14[%c0_72, %c0_73, %c0_74] : memref<2x3x512xf32, #tpu.memory_space<vmem>>, vector<2x2x512xf32>
    tpu.vector_store %arg14[%c0_72, %c0_73, %c0_74], %141 {strides = array<i32>} : memref<2x3x512xf32, #tpu.memory_space<vmem>>, vector<2x2x512xf32>,
    %c0_75 = arith.constant 0 : index
    %c2_76 = arith.constant 2 : index
    %c0_77 = arith.constant 0 : index
    %143 = vector.load %arg14[%c0_75, %c2_76, %c0_77] : memref<2x3x512xf32, #tpu.memory_space<vmem>>, vector<2x1x512xf32>
    %144 = vector.shape_cast %143 : vector<2x1x512xf32> to vector<2x512xf32>
    %145 = vector.shape_cast %137 : vector<2x512xf32> to vector<2x1x512xf32>
    tpu.vector_store %arg14[%c0_75, %c2_76, %c0_77], %145 {strides = array<i32>} : memref<2x3x512xf32, #tpu.memory_space<vmem>>, vector<2x1x512xf32>,
    return
  }
  func.func @transform_0(%arg0: i32) -> (i32, i32, i32) {
    %c0_i32 = arith.constant 0 : i32
    %c0_i32_0 = arith.constant 0 : i32
    %c0_i32_1 = arith.constant 0 : i32
    return %arg0, %c0_i32, %c0_i32_0 : i32, i32, i32
  }
  func.func @transform_1(%arg0: i32) -> (i32, i32, i32) {
    %c0_i32 = arith.constant 0 : i32
    %c0_i32_0 = arith.constant 0 : i32
    %c0_i32_1 = arith.constant 0 : i32
    return %arg0, %c0_i32, %c0_i32_0 : i32, i32, i32
  }
  func.func @transform_2(%arg0: i32) -> (i32, i32, i32) {
    %c0_i32 = arith.constant 0 : i32
    %c0_i32_0 = arith.constant 0 : i32
    %c0_i32_1 = arith.constant 0 : i32
    %c0_i32_2 = arith.constant 0 : i32
    return %c0_i32, %c0_i32_0, %c0_i32_1 : i32, i32, i32
  }
  func.func @transform_3(%arg0: i32) -> (i32, i32) {
    %c0_i32 = arith.constant 0 : i32
    %c0_i32_0 = arith.constant 0 : i32
    %c0_i32_1 = arith.constant 0 : i32
    return %c0_i32, %c0_i32_0 : i32, i32
  }
  func.func @transform_4(%arg0: i32) -> (i32, i32) {
    %c0_i32 = arith.constant 0 : i32
    %c0_i32_0 = arith.constant 0 : i32
    %c0_i32_1 = arith.constant 0 : i32
    return %c0_i32, %c0_i32_0 : i32, i32
  }
  func.func @transform_5(%arg0: i32) -> (i32, i32, i32) {
    %c0_i32 = arith.constant 0 : i32
    %c0_i32_0 = arith.constant 0 : i32
    %c0_i32_1 = arith.constant 0 : i32
    %c0_i32_2 = arith.constant 0 : i32
    return %c0_i32, %c0_i32_0, %c0_i32_1 : i32, i32, i32
  }
  func.func @transform_6(%arg0: i32) -> (i32, i32) {
    %c0_i32 = arith.constant 0 : i32
    %c0_i32_0 = arith.constant 0 : i32
    %c0_i32_1 = arith.constant 0 : i32
    return %c0_i32, %c0_i32_0 : i32, i32
  }
  func.func @transform_7(%arg0: i32) -> (i32, i32) {
    %c0_i32 = arith.constant 0 : i32
    %c0_i32_0 = arith.constant 0 : i32
    %c0_i32_1 = arith.constant 0 : i32
    return %c0_i32, %c0_i32_0 : i32, i32
  }
  func.func @transform_8(%arg0: i32) -> (i32, i32) {
    %c0_i32 = arith.constant 0 : i32
    %c0_i32_0 = arith.constant 0 : i32
    %c0_i32_1 = arith.constant 0 : i32
    return %c0_i32, %c0_i32_0 : i32, i32
  }
  func.func @transform_9(%arg0: i32) -> (i32, i32) {
    %c0_i32 = arith.constant 0 : i32
    %c0_i32_0 = arith.constant 0 : i32
    %c0_i32_1 = arith.constant 0 : i32
    return %c0_i32, %c0_i32_0 : i32, i32
  }
  func.func @transform_10(%arg0: i32) -> (i32, i32) {
    %c0_i32 = arith.constant 0 : i32
    %c0_i32_0 = arith.constant 0 : i32
    %c0_i32_1 = arith.constant 0 : i32
    return %c0_i32, %c0_i32_0 : i32, i32
  }
  func.func @transform_11(%arg0: i32) -> i32 {
    %c0_i32 = arith.constant 0 : i32
    %c0_i32_0 = arith.constant 0 : i32
    return %c0_i32 : i32
  }
  func.func @transform_12(%arg0: i32) -> (i32, i32, i32) {
    %c0_i32 = arith.constant 0 : i32
    %c0_i32_0 = arith.constant 0 : i32
    %c0_i32_1 = arith.constant 0 : i32
    return %arg0, %c0_i32, %c0_i32_0 : i32, i32, i32
  }
  func.func @transform_13(%arg0: i32) -> (i32, i32, i32) {
    %c0_i32 = arith.constant 0 : i32
    %c0_i32_0 = arith.constant 0 : i32
    %c0_i32_1 = arith.constant 0 : i32
    return %arg0, %c0_i32, %c0_i32_0 : i32, i32, i32
  }
}

</mosaic_0001>

<bundles_post_ra>
// kernel: gmsdr_cell_forward.1
= control target key start
LH: loop header
LB: loop body
LE: loop exit
PB: predicated region body
PF: predicated region fallthrough
CT: control target
= control target key end

     0   :  { %s3091_s27 = smov 0   ;;  %s3596_s0 = inlined_call_operand.vmem [shape: f32[2,16,136], index: 0, kind: input, shape index: {}]   ;;  %s3597_s1 = inlined_call_operand.vmem [shape: f32[4,3,512], index: 1, kind: input, shape index: {}, may-alias: {1,13}]   ;;  %s3598_s2 = inlined_call_operand.vmem [shape: bf16[2,16,16], index: 2, kind: input, shape index: {}]   ;;  %s3599_s3 = inlined_call_operand.vmem [shape: f32[16,10], index: 3, kind: input, shape index: {}]   ;;  %s3600_s4 = inlined_call_operand.vmem [shape: f32[10,16], index: 4, kind: input, shape index: {}]   ;;  %s3601_s5 = inlined_call_operand.vmem [shape: bf16[7,68,32], index: 5, kind: input, shape index: {}]   ;;  %s3602_s6 = inlined_call_operand.vmem [shape: f32[1,32], index: 6, kind: input, shape index: {}]   ;;  %s3603_s7 = inlined_call_operand.vmem [shape: f32[32,32], index: 7, kind: input, shape index: {}]   ;;  %s3604_s8 = inlined_call_operand.vmem [shape: f32[16,32], index: 8, kind: input, shape index: {}]   ;;  %s3605_s9 = inlined_call_operand.vmem [shape: f32[3,512], index: 9, kind: input, shape index: {}]   ;;  %s3606_s10 = inlined_call_operand.vmem [shape: f32[1,512], index: 10, kind: input, shape index: {}]   ;;  %s3607_s11 = inlined_call_operand.<no memory space> [shape: f32[1], index: 11, kind: input, shape index: {}]   ;;  %s3608_s12 = inlined_call_operand.vmem [shape: f32[4,1,512], index: 12, kind: output, shape index: {0}]   ;;  %s3609_s13 = inlined_call_operand.vmem [shape: f32[4,3,512], index: 13, kind: output, shape index: {1}, may-alias: {1,13}]  }
   0x1   :  { %19 = sst [smem:[#allocation2]] %s3607_s11 }
   0x2 LB: > { %s3097_s28 = sadd.s32 4294967295, %s3005_s27   ;;  %p2487_p0 = scmp.ge.s32.totalorder %s3005_s27, 1  ;;  %s3005_s27 = sphi %s3091_s27, %s25_s27  }
   0x3   : > { %p403_p1 = scmp.lt.s32.totalorder %s3005_s27, 3 }
   0x5   : > { %p404_p2 = pnand %p2487_p0, %p403_p1 }
   0x6   : > { %v487_v0 = vld [vmem:[%s3600_s4] sm:$0xff] (!%p404_p2)  ;;  %v488_v1 = vld [vmem:[%s3600_s4 + $0x8] sm:$0x3] (!%p404_p2)  ;;  %vm496_vm0 = vcmask (!%p404_p2), 1041408   ;;  %vm3007_vm1 = vmmov (!%p404_p2), 1   ;;  %vm489_vm3 = vcmask (!%p404_p2), 80896  }
   0x7   : > { %407 = sbr.rel (%p404_p2) target bundleno = 1879 (0x757), region = 68  ;;  %v485_v2 = vld [vmem:[%s3599_s3] sm:$0xff] (!%p404_p2)  ;;  %v2810_v3 = vpack.c.bf16 (!%p404_p2), %v488_v1, %v487_v0  ;;  %vm2811_vm2 = vmpackc.low (!%p404_p2), %vm496_vm0, %vm3007_vm1  ;;  %p459_p3 = scmp.lt.s32.totalorder (!%p404_p2), %s3097_s28, 1  ;;  %v3008_v4 = vmov (!%p404_p2), 0   ;;  %v486_v5 = vld [vmem:[%s3599_s3 + $0x8] sm:$0xff] (!%p404_p2)  ;;  %vm577_vm4 = vcmask (!%p404_p2), 130048  }
   0x8   : > { %2695 = vmatprep.mubr.msk.f32.mxu1 (!%p404_p2), %vm489_vm3, %v485_v2  ;;  %2945 = vset.pattern.permute.xlu1 (!%p404_p2), %v3008_v4  ;;  %v3135_v11 = vld [vmem:[%s3598_s2] sm:$0xff] (!%p404_p2)   ;;  %s3009_s26 = smov (!%p404_p2), 60   ;;  %v2948_v16 = vld [vmem:[%s3601_s5 + $0x2c] sm:$0xff] (!%p404_p2)   ;;  %v2949_v17 = vld [vmem:[%s3601_s5 + $0x34] sm:$0xff] (!%p404_p2)   ;;  %vm742_vm5 = vcmask (!%p404_p2), 556032   ;;  %vm617_vm6 = vcmask (!%p404_p2), 490496  }
   0x9   : > { %2812 = vmatprep.subr.msk.bf16.mxu1 (!%p404_p2), %vm2811_vm2, %v2810_v3  ;;  %2944 = vset.pattern.permute.xlu0 (!%p404_p2), %v3008_v4  ;;  %v2947_v15 = vld [vmem:[%s3601_s5 + $0x24] sm:$0xff] (!%p404_p2)   ;;  %v2950_v18 = vld [vmem:[%s3601_s5 + $0x3c] sm:$0xff] (!%p404_p2)   ;;  %v2954_v46 = vld [vmem:[%s3601_s5 + $0x10] sm:$0xff] (!%p404_p2)   ;;  %s2490_s22 = sshll.u32 (!%p404_p2), %s3097_s28, 1  ;;  %vm2096_vm7 = vcmask (!%p404_p2), 1042432   ;;  %vm2131_vm8 = vcmask (!%p404_p2), 1041409  }
   0xa   : > { %2815 = vmatpush3.bf16.msk.msra.mxu1 (!%p404_p2), %vm2811_vm2, %v2810_v3  ;;  %v2951_v20 = vld [vmem:[%s3601_s5 + $0x44] ss:$0 sps:$4 sm:$0x33] (!%p404_p2)   ;;  %v2953_v45 = vld [vmem:[%s3601_s5 + $0x8] sm:$0xff] (!%p404_p2)   ;;  %v2955_v48 = vld [vmem:[%s3601_s5 + $0x18] sm:$0xff] (!%p404_p2)   ;;  %p465_p4 = scmp.lt.s32.totalorder (!%p404_p2), %s2490_s22, 3 }
   0xb   : > { %v750_v23 = vsel (!%p404_p2), %vm496_vm0, %v2951_v20, 0  ;;  %v2952_v25 = vld [vmem:[%s3601_s5] sm:$0xff] (!%p404_p2)   ;;  %v3224_v59 = vld [vmem:[%s3598_s2 + $0x8] sm:$0xff] (!%p404_p2)   ;;  %vm2134_vm9 = vcmask (!%p404_p2), 17408   ;;  %vm1750_vm10 = vcmask (!%p404_p2), 261120   ;;  %s3015_s24 = smov (!%p404_p2), 32  }
   0xc   : > { %v2956_v50 = vld [vmem:[%s3601_s5 + $0x20] ss:$0 sps:$4 sm:$0x33] (!%p404_p2)   ;;  %vm2035_vm15 = vcmask (!%p404_p2), 523264  }
   0xd   : > { %2696 = vmatmul.mubr.msk.f32.vlgmr.msra.gmra.mrb[0].mxu1 (!%p404_p2), %vm489_vm3, %v486_v5  ;;  %v835_v55 = vsel (!%p404_p2), %vm496_vm0, %v2956_v50, 0 }
   0xe   : > { %s460_s19 = scalar_select %p459_p3, %s3097_s28, 1  ;;  %676 = vmatprep.mubr.bf16.mxu1 %v3008_v4 }
   0xf   : > { %s3611_s22 = smov (!%p465_p4, %s2490_s22), 3 }
  0x10   : > { %s2627_s20 = sshll.u32 %s460_s19, 5  ;;  %s2628_s28 = sshll.u32 %s3611_s22, 4 }
  0x11   : > { %s463_s23 = scalar_lea.vmem %s3596_s0, %s2627_s20  ;;  %s469_s16 = scalar_lea.vmem %s3597_s1, %s2628_s28 }
  0x12   : > { %v3121_v6 = vld [vmem:[%s463_s23 + $0x8] sm:$0xff]  ;;  %v3123_v7 = vld [vmem:[%s463_s23 + $0x18] sm:$0xff]  ;;  %v3125_v8 = vld [vmem:[%s463_s23] sm:$0xff]  ;;  %s3387_s19 = scalar_lea.vmem %s3609_s13, %s2628_s28  ;;  %s2494_s25 = sshll.u32 %s3611_s22, 2 }
  0x13   : > { %v635_v9 = vpack.c.bf16 %v3123_v7, %v3121_v6  ;;  %v3129_v10 = vld [vmem:[%s463_s23 + $0x10] sm:$0xff]  ;;  %v2884_v12 = vpack.i.bf16 %v3121_v6, %v3125_v8  ;;  %s3014_s23 = smov 96   ;;  %s475_s30 = scalar_lea.vmem %s3608_s12, %s2494_s25 }
  0x14   : > { %v622_v13 = vpack.c.bf16 %v3129_v10, %v3125_v8  ;;  %v2889_v14 = vpack.i.bf16 %v3123_v7, %v3129_v10 }
  0x15   : > { %644 = vmatprep.subr.bf16.mxu1 %v635_v9  ;;  %2885 = vrot.lane.b32.xlu1 %v2884_v12, %s3009_s26  ;;  %v2959_v12 = vld [vmem:[%s3601_s5 + $0x50] sm:$0xff]  }
  0x16   : > { %645 = vmatpush1.bf16.msra.mxu1 %v622_v13 }
  0x17   : > { %2698 = vmatprep.subr.bf16.mxu1 %v2947_v15 }
  0x19   : > { %2502 = vmatmul.mubr.msk.bf16.vlgmr.msra.gmra.mrb[4].mxu1 %vm577_vm4, %v3135_v11  ;;  %2890 = vrot.lane.b32.xlu1 %v2889_v14, %s3009_s26  ;;  %v2961_v14 = vld [vmem:[%s3601_s5 + $0x60] sm:$0xff]  }
  0x1a   : > { %2699 = vmatpush3.bf16.msra.mxu1 %v2947_v15 }
  0x1b   : > { %2700 = vmatprep.subr.bf16.mxu1 %v2948_v16 }
  0x1e   : > { %2701 = vmatpush3.bf16.msra.mxu1 %v2948_v16 }
  0x1f   : > { %2702 = vmatprep.subr.bf16.mxu1 %v2949_v17 }
  0x22   : > { %2703 = vmatpush3.bf16.msra.mxu1 %v2949_v17 }
  0x23   : > { %2704 = vmatprep.subr.bf16.mxu1 %v2950_v18 }
  0x26   : > { %2705 = vmatpush3.bf16.msra.mxu1 %v2950_v18 }
  0x27   : > { %2848 = vmatprep.subr.msk.bf16.mxu1 %vm496_vm0, %v2951_v20 }
  0x2a   : > { %2707 = vmatpush3.bf16.msra.mxu1 %v750_v23  ;;  %v2963_v23 = vld [vmem:[%s3601_s5 + $0x6c] sm:$0xff]  }
  0x2b   : > { %2712 = vmatprep.subr.bf16.mxu1 %v2952_v25 }
  0x87   : > { %v2886_v47 = vpop.permute.xlu1 %2885 }
  0x88   : > { %v2888_v51 = vunpack.i.h.bf16 %v2886_v47  ;;  %v2887_v52 = vunpack.i.l.bf16 %v2886_v47 }
  0x8a   : > { %v618_v56 = vsel %vm617_vm6, %v2887_v52, %v2888_v51 }
  0x8b   : > { %v2891_v49 = vpop.permute.xlu1 %2890 }
  0x8c   : > { %v2893_v53 = vunpack.i.h.bf16 %v2891_v49  ;;  %v2892_v54 = vunpack.i.l.bf16 %v2891_v49 }
  0x8e   : > { %v619_v57 = vsel %vm617_vm6, %v2892_v54, %v2893_v53 }
  0x8f   : > { %v623_v58 = vpack.c.bf16 %v619_v57, %v618_v56 }
  0xe0   : > { %v3159_v19 = vpop.f32.mrb[0].mxu1 }
  0xe1   : > { %v576_v21 = vmax.f32 %v3159_v19, 0.0  ;;  %v3165_v22 = vpop.f32.mrb[1].mxu1  ;;  %v2962_v19 = vld [vmem:[%s3601_s5 + $0x68] ss:$0 sps:$4 sm:$0x33]  }
  0xe2   : > { %v575_v34 = vmax.f32 %v3165_v22, 0.0 }
  0xe3   : > { %v581_v24 = vsel %vm577_vm4, %v576_v21, -inf }
  0xe4   : > { %582 = vmax.xlane.f32.xlu1 %v581_v24  ;;  %v578_v35 = vsel %vm577_vm4, %v575_v34, -inf }
  0xec   : > { %v3175_v26 = vpop.f32.mrb[4].mxu1 }
  0xed   : > { %v3177_v27 = vpop.f32.mrb[5].mxu1 }
  0xee   : > { %v3179_v28 = vpop.f32.mrb[6].mxu1  ;;  %v2874_v29 = vpack.i.bf16 %v3177_v27, %v3175_v26 }
  0xef   : > { %v703_v30 = vpack.c.bf16 %v3179_v28, %v3175_v26  ;;  %v3185_v31 = vpop.f32.mrb[7].mxu1 }
  0xf0   : > { %v2879_v32 = vpack.i.bf16 %v3185_v31, %v3179_v28  ;;  %v886_v33 = vpack.c.bf16 %v3185_v31, %v3177_v27  ;;  %2875 = vrot.lane.b32.xlu0 %v2874_v29, %s3009_s26 }
  0xf1   : > { %2708 = vmatprep.mubr.msk.bf16.mxu1 %vm742_vm5, %v703_v30 }
  0xf4   : > { %2880 = vrot.lane.b32.xlu0 %v2879_v32, %s3009_s26 }
 0x113   : > { %579 = vmax.xlane.f32.xlu0 %v578_v35 }
 0x162   : > { %v2876_v36 = vpop.permute.xlu0 %2875 }
 0x163   : > { %v2878_v37 = vunpack.i.h.bf16 %v2876_v36  ;;  %v2877_v38 = vunpack.i.l.bf16 %v2876_v36 }
 0x165   : > { %v699_v42 = vsel %vm617_vm6, %v2877_v38, %v2878_v37 }
 0x166   : > { %v2881_v39 = vpop.permute.xlu0 %2880 }
 0x167   : > { %v2883_v40 = vunpack.i.h.bf16 %v2881_v39  ;;  %v2882_v41 = vunpack.i.l.bf16 %v2881_v39 }
 0x169   : > { %v700_v43 = vsel %vm617_vm6, %v2882_v41, %v2883_v40 }
 0x16a   : > { %v704_v44 = vpack.c.bf16 %v700_v43, %v699_v42 }
 0x16c   : > { %2709 = vmatmul.mubr.msk.bf16.vlgmr.msra.gmra.mrb[8].mxu1 %vm742_vm5, %v704_v44 }
 0x16d   : > { %2713 = vmatpush3.bf16.msra.mxu1 %v2952_v25  ;;  %2722 = vmatprep.mubr.msk.bf16.mxu1 %vm742_vm5, %v622_v13  ;;  %v2960_v13 = vld [vmem:[%s3601_s5 + $0x58] sm:$0xff]  }
 0x16e   : > { %2714 = vmatprep.subr.bf16.mxu1 %v2953_v45 }
 0x171   : > { %2715 = vmatpush3.bf16.msra.mxu1 %v2953_v45  ;;  %v583_v60 = vpop.xlane.xlu1 %582 }
 0x172   : > { %2716 = vmatprep.subr.bf16.mxu1 %v2954_v46  ;;  %v585_v61 = vsub.f32 %v576_v21, %v583_v60  ;;  %v1000_v21 = vsel %vm496_vm0, %v2962_v19, 0 }
 0x174   : > { %v588_v0 = vmul.f32 1.442695, %v585_v61  ;;  %v2964_v61 = vld [vmem:[%s3601_s5 + $0x74] sm:$0xff]  }
 0x175   : > { %2717 = vmatpush3.bf16.msra.mxu1 %v2954_v46 }
 0x176   : > { %2718 = vmatprep.subr.bf16.mxu1 %v2955_v48 }
 0x179   : > { %2719 = vmatpush3.bf16.msra.mxu1 %v2955_v48 }
 0x17a   : > { %2849 = vmatprep.subr.msk.bf16.mxu1 %vm496_vm0, %v2956_v50 }
 0x17d   : > { %2721 = vmatpush3.bf16.msra.mxu1 %v835_v55 }
 0x17e   : > { %887 = vmatprep.subr.bf16.mxu1 %v886_v33 }
 0x180   : > { %2723 = vmatmul.mubr.msk.bf16.vlgmr.msra.gmra.mrb[8].mxu1 %vm742_vm5, %v623_v58 }
 0x181   : > { %888 = vmatpush1.bf16.msra.mxu1 %v703_v30  ;;  %919 = vmatprep.mubr.bf16.mxu1 %v3008_v4 }
 0x182   : > { %1066 = vmatprep.subr.bf16.mxu1 %v886_v33 }
 0x188   : > { %2526 = vmatmul.mubr.msk.bf16.vlgmr.msra.gmra.mrb[12].mxu1 %vm577_vm4, %v3135_v11  ;;  %v2958_v11 = vld [vmem:[%s3601_s5 + $0x48] sm:$0xff]  }
 0x189   : > { %1067 = vmatpush1.bf16.msra.mxu1 %v703_v30  ;;  %1098 = vmatprep.mubr.bf16.mxu1 %v3008_v4 }
 0x18a   : > { %2726 = vmatprep.subr.bf16.mxu0 %v2958_v11 }
 0x18b   : > { %2727 = vmatpush3.bf16.msra.mxu0 %v2958_v11 }
 0x18c   : > { %2728 = vmatprep.subr.bf16.mxu0 %v2959_v12 }
 0x18f   : > { %2729 = vmatpush3.bf16.msra.mxu0 %v2959_v12  ;;  %v2968_v12 = vld [vmem:[%s3601_s5 + $0x90] sm:$0xff]  }
 0x190   : > { %2546 = vmatmul.mubr.msk.bf16.vlgmr.msra.gmra.mrb[16].mxu1 %vm577_vm4, %v3224_v59  ;;  %2730 = vmatprep.subr.bf16.mxu0 %v2960_v13 }
 0x191   : > { %1259 = vmatprep.mubr.bf16.mxu1 %v3008_v4 }
 0x193   : > { %2731 = vmatpush3.bf16.msra.mxu0 %v2960_v13 }
 0x194   : > { %2732 = vmatprep.subr.bf16.mxu0 %v2961_v14 }
 0x197   : > { %2733 = vmatpush3.bf16.msra.mxu0 %v2961_v14 }
 0x198   : > { %2850 = vmatprep.subr.msk.bf16.mxu0 %vm496_vm0, %v2962_v19 }
 0x19b   : > { %2735 = vmatpush3.bf16.msra.mxu0 %v1000_v21  ;;  %v2970_v21 = vld [vmem:[%s3601_s5 + $0xa0] sm:$0xff]  }
 0x19c   : > { %2740 = vmatprep.subr.bf16.mxu0 %v2963_v23 }
 0x1a0   : > { %v580_v62 = vpop.xlane.xlu0 %579 }
 0x1a1   : > { %v584_v63 = vsub.f32 %v575_v34, %v580_v62  ;;  %v2965_v62 = vld [vmem:[%s3601_s5 + $0x7c] sm:$0xff]  }
 0x1a3   : > { %v586_v1 = vmul.f32 1.442695, %v584_v63  ;;  %v2966_v63 = vld [vmem:[%s3601_s5 + $0x84] sm:$0xff]  }
 0x1a5   : > { %2983 = vpow2.f32 %v586_v1  ;;  %v2967_v1 = vld [vmem:[%s3601_s5 + $0x8c] ss:$0 sps:$4 sm:$0x33]  }
 0x1a6   : > { %2985 = vpow2.f32 %v588_v0  ;;  %v1171_v11 = vsel %vm496_vm0, %v2967_v1, 0 }
 0x1af   : > { %v3231_v2 = vpop.eup %2983 }
 0x1b0   : > { %v590_v3 = vsel %vm577_vm4, %v3231_v2, 0.0  ;;  %v3235_v5 = vpop.eup %2985 }
 0x1b1   : > { %591 = vadd.xlane.f32.xlu0 %v590_v3  ;;  %v593_v9 = vsel %vm577_vm4, %v3235_v5, 0.0 }
 0x1b5   : > { %594 = vadd.xlane.f32.xlu0 %v593_v9 }
 0x23e   : > { %v592_v20 = vpop.xlane.xlu0 %591 }
 0x242   : > { %v595_v35 = vpop.xlane.xlu0 %594 }
 0x243   : > { %2987 = vrcp.f32 %v595_v35 }
 0x244   : > { %2989 = vrcp.f32 %v592_v20  ;;  %v2969_v20 = vld [vmem:[%s3601_s5 + $0x98] sm:$0xff]  }
 0x24d   : > { %v2988_v47 = vpop.eup %2987 }
 0x24e   : > { %v2990_v48 = vpop.eup %2989  ;;  %v599_v49 = vmul.f32 %v2988_v47, %v3235_v5 }
 0x24f   : > { %v597_v50 = vmul.f32 %v2990_v48, %v3231_v2 }
 0x251   : > { %v3297_v51 = vpack.c.bf16 %v599_v49, %v597_v50 }
 0x253   : > { %v3251_v15 = vpop.f32.mrb[8].mxu1 }
 0x254   : > { %v3253_v16 = vpop.f32.mrb[9].mxu1 }
 0x255   : > { %v3255_v17 = vpop.f32.mrb[10].mxu1 }
 0x256   : > { %v3257_v18 = vpop.f32.mrb[11].mxu1 }
 0x25b   : > { %v921_v22 = vpop.f32.mrb[12].mxu1 }
 0x25c   : > { %v930_v24 = vmul.f32 2.0, %v921_v22  ;;  %v923_v25 = vpop.f32.mrb[13].mxu1  ;;  %v2971_v22 = vld [vmem:[%s3601_s5 + $0xa8] sm:$0xff]  }
 0x25d   : > { %v931_v29 = vmul.f32 2.0, %v923_v25  ;;  %v925_v30 = vpop.f32.mrb[14].mxu1 }
 0x25e   : > { %v934_v32 = vsub.f32 %v930_v24, %v3125_v8  ;;  %v932_v33 = vmul.f32 2.0, %v925_v30  ;;  %v927_v34 = vpop.f32.mrb[15].mxu1 }
 0x25f   : > { %v935_v36 = vsub.f32 %v931_v29, %v3121_v6  ;;  %v933_v37 = vmul.f32 2.0, %v927_v34  ;;  %v2973_v29 = vld [vmem:[%s3601_s5 + $0xb4] sm:$0xff]  }
 0x260   : > { %v936_v38 = vsub.f32 %v932_v33, %v3129_v10 }
 0x261   : > { %v937_v39 = vsub.f32 %v933_v37, %v3123_v7  ;;  %v2894_v40 = vpack.i.bf16 %v935_v36, %v934_v32 }
 0x262   : > { %v954_v41 = vpack.c.bf16 %v936_v38, %v934_v32 }
 0x263   : > { %2895 = vrot.lane.b32.xlu1 %v2894_v40, %s3009_s26  ;;  %v3272_v42 = vpop.f32.mrb[16].mxu1  ;;  %v2899_v43 = vpack.i.bf16 %v937_v39, %v936_v38 }
 0x264   : > { %2736 = vmatprep.mubr.msk.bf16.mxu0 %vm742_vm5, %v954_v41  ;;  %v3275_v8 = vpop.f32.mrb[17].mxu1 }
 0x265   : > { %v2904_v6 = vpack.i.bf16 %v3275_v8, %v3272_v42  ;;  %v3279_v44 = vpop.f32.mrb[18].mxu1  ;;  %2900 = vrot.lane.b32.xlu0 %v2899_v43, %s3009_s26 }
 0x266   : > { %v1125_v7 = vpack.c.bf16 %v3279_v44, %v3272_v42  ;;  %v3284_v10 = vpop.f32.mrb[19].mxu1 }
 0x267   : > { %v2909_v45 = vpack.i.bf16 %v3284_v10, %v3279_v44  ;;  %v1226_v46 = vpack.c.bf16 %v3284_v10, %v3275_v8  ;;  %2905 = vrot.lane.b32.xlu1 %v2904_v6, %s3009_s26 }
 0x269   : > { %1227 = vmatprep.subr.bf16.mxu1 %v1226_v46 }
 0x26a   : > { %1228 = vmatpush1.bf16.msra.mxu1 %v1125_v7 }
 0x26b   : > { %2910 = vrot.lane.b32.xlu1 %v2909_v45, %s3009_s26  ;;  %1398 = vmatprep.subr.bf16.mxu1 %v1226_v46 }
 0x26d   : > { %2563 = vmatmul.mubr.msk.bf16.vlgmr.msra.gmra.mrb[20].mxu1 %vm577_vm4, %v3224_v59 }
 0x26e   : > { %1399 = vmatpush1.bf16.msra.mxu1 %v1125_v7  ;;  %1430 = vmatprep.mubr.bf16.mxu1 %v3008_v4 }
 0x275   : > { %2580 = vmatmul.mubr.msk.bf16.vlgmr.msra.gmra.mrb[24].mxu1 %vm577_vm4, %v3297_v51 }
 0x276   : > { %1591 = vmatprep.mubr.bf16.mxu1 %v3008_v4 }
 0x2d5   : > { %v2896_v52 = vpop.permute.xlu1 %2895 }
 0x2d6   : > { %v2898_v53 = vunpack.i.h.bf16 %v2896_v52  ;;  %v2897_v54 = vunpack.i.l.bf16 %v2896_v52 }
 0x2d7   : > { %v2901_v55 = vpop.permute.xlu0 %2900 }
 0x2d8   : > { %v2903_v56 = vunpack.i.h.bf16 %v2901_v55  ;;  %v2902_v57 = vunpack.i.l.bf16 %v2901_v55  ;;  %v950_v58 = vsel %vm617_vm6, %v2897_v54, %v2898_v53 }
 0x2d9   : > { %v2906_v4 = vpop.permute.xlu1 %2905 }
 0x2da   : > { %v951_v59 = vsel %vm617_vm6, %v2902_v57, %v2903_v56  ;;  %v2908_v5 = vunpack.i.h.bf16 %v2906_v4  ;;  %v2907_v9 = vunpack.i.l.bf16 %v2906_v4 }
 0x2db   : > { %v955_v60 = vpack.c.bf16 %v951_v59, %v950_v58  ;;  %v2974_v59 = vld [vmem:[%s3601_s5 + $0xbc] sm:$0xff]  }
 0x2dc   : > { %v1121_v14 = vsel %vm617_vm6, %v2907_v9, %v2908_v5  ;;  %v3380_v9 = vld [vmem:[%s469_s16 + $0x10] sm:$0x77] }
 0x2dd   : > { %2737 = vmatmul.mubr.msk.bf16.vlgmr.msra.gmra.mrb[0].mxu0 %vm742_vm5, %v955_v60  ;;  %v2911_v0 = vpop.permute.xlu1 %2910  ;;  %v2976_v60 = vld [vmem:[%s3601_s5 + $0xcc] sm:$0xff]  }
 0x2de   : > { %2741 = vmatpush3.bf16.msra.mxu0 %v2963_v23  ;;  %2750 = vmatprep.mubr.msk.bf16.mxu0 %vm742_vm5, %v1125_v7  ;;  %v2913_v2 = vunpack.i.h.bf16 %v2911_v0  ;;  %v2912_v3 = vunpack.i.l.bf16 %v2911_v0  ;;  %v2972_v23 = vld [vmem:[%s3601_s5 + $0xb0] ss:$0 sps:$4 sm:$0x33]  }
 0x2df   : > { %2742 = vmatprep.subr.bf16.mxu0 %v2964_v61  ;;  %v1340_v24 = vsel %vm496_vm0, %v2972_v23, 0 }
 0x2e0   : > { %v1122_v13 = vsel %vm617_vm6, %v2912_v3, %v2913_v2 }
 0x2e1   : > { %v1126_v19 = vpack.c.bf16 %v1122_v13, %v1121_v14  ;;  %v2352_v13 = vld [vmem:[%s469_s16 + $0x8] sm:$0x66]  ;;  %v2353_v14 = vld [vmem:[%s469_s16 + $0x10] sm:$0x66] }
 0x2e2   : > { %2743 = vmatpush3.bf16.msra.mxu0 %v2964_v61 }
 0x2e3   : > { %2744 = vmatprep.subr.bf16.mxu0 %v2965_v62 }
 0x2e6   : > { %2745 = vmatpush3.bf16.msra.mxu0 %v2965_v62  ;;  %v2977_v62 = vld [vmem:[%s3601_s5 + $0xd4] ss:$0 sps:$4 sm:$0x33]  }
 0x2e7   : > { %2746 = vmatprep.subr.bf16.mxu0 %v2966_v63  ;;  %v1503_v3 = vsel %vm496_vm0, %v2977_v62, 0 }
 0x2ea   : > { %2747 = vmatpush3.bf16.msra.mxu0 %v2966_v63 }
 0x2eb   : > { %2851 = vmatprep.subr.msk.bf16.mxu0 %vm496_vm0, %v2967_v1 }
 0x2ee   : > { %2749 = vmatpush3.bf16.msra.mxu0 %v1171_v11  ;;  %v3382_v11 = vld [vmem:[%s469_s16 + $0x18] sm:$0x77] }
 0x2ef   : > { %2754 = vmatprep.subr.bf16.mxu0 %v2968_v12 }
 0x2f1   : > { %2751 = vmatmul.mubr.msk.bf16.vlgmr.msra.gmra.mrb[0].mxu0 %vm742_vm5, %v1126_v19  ;;  %v2354_v19 = vld [vmem:[%s469_s16 + $0x18] sm:$0x66] }
 0x2f2   : > { %2755 = vmatpush3.bf16.msra.mxu0 %v2968_v12  ;;  %v2351_v12 = vld [vmem:[%s469_s16] sm:$0x66] }
 0x2f3   : > { %2756 = vmatprep.subr.bf16.mxu0 %v2969_v20 }
 0x2f6   : > { %2757 = vmatpush3.bf16.msra.mxu0 %v2969_v20  ;;  %v2619_v20 = vrot.slane %v2351_v12, 9 }
 0x2f7   : > { %2758 = vmatprep.subr.bf16.mxu0 %v2970_v21 }
 0x2fa   : > { %2759 = vmatpush3.bf16.msra.mxu0 %v2970_v21  ;;  %v2620_v21 = vrot.slane %v2352_v13, 9 }
 0x2fb   : > { %2760 = vmatprep.subr.bf16.mxu0 %v2971_v22 }
 0x2fe   : > { %2761 = vmatpush3.bf16.msra.mxu0 %v2971_v22  ;;  %v2621_v22 = vrot.slane %v2353_v14, 9 }
 0x2ff   : > { %2852 = vmatprep.subr.msk.bf16.mxu0 %vm496_vm0, %v2972_v23  ;;  %v2978_v23 = vld [vmem:[%s3601_s5 + $0xd8] sm:$0xff]  }
 0x302   : > { %2763 = vmatpush3.bf16.msra.mxu0 %v1340_v24 }
 0x303   : > { %2768 = vmatprep.subr.bf16.mxu0 %v2973_v29 }
 0x340   : > { %v1261_v25 = vpop.f32.mrb[20].mxu1 }
 0x341   : > { %v1270_v30 = vmul.f32 2.0, %v1261_v25  ;;  %v1263_v32 = vpop.f32.mrb[21].mxu1  ;;  %v2048_v25 = vld [vmem:[%s469_s16] sm:$0x77] }
 0x342   : > { %v1271_v33 = vmul.f32 2.0, %v1263_v32  ;;  %v1265_v34 = vpop.f32.mrb[22].mxu1 }
 0x343   : > { %v1274_v35 = vsub.f32 %v1270_v30, %v3175_v26  ;;  %v1272_v36 = vmul.f32 2.0, %v1265_v34  ;;  %v1267_v37 = vpop.f32.mrb[23].mxu1  ;;  %v2622_v30 = vrot.slane %v2354_v19, 9  ;;  %v2980_v34 = vld [vmem:[%s3601_s5 + $0xe8] sm:$0xff]  }
 0x344   : > { %v1275_v38 = vsub.f32 %v1271_v33, %v3177_v27  ;;  %v1273_v39 = vmul.f32 2.0, %v1267_v37  ;;  %v2979_v33 = vld [vmem:[%s3601_s5 + $0xe0] sm:$0xff]   ;;  %v2982_v37 = vld [vmem:[%s3601_s5 + $0xf8] ss:$0 sps:$4 sm:$0x33]  }
 0x345   : > { %v1276_v40 = vsub.f32 %v1272_v36, %v3179_v28  ;;  %v1858_v36 = vlaneseq }
 0x346   : > { %v1277_v41 = vsub.f32 %v1273_v39, %v3185_v31  ;;  %v2914_v43 = vpack.i.bf16 %v1275_v38, %v1274_v35  ;;  %v1668_v38 = vsel %vm496_vm0, %v2982_v37, 0 }
 0x347   : > { %v1294_v6 = vpack.c.bf16 %v1276_v40, %v1274_v35  ;;  %v2981_v35 = vld [vmem:[%s3601_s5 + $0xf0] sm:$0xff]   ;;  %v3413_v39 = vshrl.u32 %v1858_v36, 7  ;;  %vm2347_vm1 = vcmp.lt.s32.totalorder %v1858_v36, 512 }
 0x348   : > { %v1432_v7 = vpop.f32.mrb[24].mxu1  ;;  %2915 = vrot.lane.b32.xlu0 %v2914_v43, %s3009_s26  ;;  %v2919_v45 = vpack.i.bf16 %v1277_v41, %v1276_v40 }
 0x349   : > { %2764 = vmatprep.mubr.msk.bf16.mxu0 %vm742_vm5, %v1294_v6  ;;  %v1434_v46 = vpop.f32.mrb[25].mxu1 }
 0x34a   : > { %v2924_v47 = vpack.i.bf16 %v1434_v46, %v1432_v7  ;;  %v1436_v26 = vpop.f32.mrb[26].mxu1  ;;  %2920 = vrot.lane.b32.xlu1 %v2919_v45, %s3009_s26  ;;  %v3418_v45 = vsub.s32 0, %v3413_v39 }
 0x34b   : > { %v1457_v48 = vpack.c.bf16 %v1436_v26, %v1432_v7  ;;  %v1438_v27 = vpop.f32.mrb[27].mxu1 }
 0x34c   : > { %v2929_v49 = vpack.i.bf16 %v1438_v27, %v1436_v26  ;;  %v1558_v50 = vpack.c.bf16 %v1438_v27, %v1434_v46  ;;  %2925 = vrot.lane.b32.xlu0 %v2924_v47, %s3009_s26  ;;  %v3421_v46 = vsub.s32 1, %v3413_v39 }
 0x34e   : > { %1559 = vmatprep.subr.bf16.mxu1 %v1558_v50  ;;  %2930 = vrot.lane.b32.xlu1 %v2929_v49, %s3009_s26 }
 0x34f   : > { %1560 = vmatpush1.bf16.msra.mxu1 %v1457_v48 }
 0x352   : > { %2597 = vmatmul.mubr.msk.bf16.vlgmr.msra.gmra.mrb[28].mxu1 %vm577_vm4, %v3297_v51  ;;  %v2975_v51 = vld [vmem:[%s3601_s5 + $0xc4] sm:$0xff]  }
 0x3ba   : > { %v2916_v28 = vpop.permute.xlu0 %2915 }
 0x3bb   : > { %v2918_v31 = vunpack.i.h.bf16 %v2916_v28  ;;  %v2917_v52 = vunpack.i.l.bf16 %v2916_v28 }
 0x3bc   : > { %v2921_v53 = vpop.permute.xlu1 %2920 }
 0x3bd   : > { %v2923_v54 = vunpack.i.h.bf16 %v2921_v53  ;;  %v2922_v55 = vunpack.i.l.bf16 %v2921_v53  ;;  %v1290_v56 = vsel %vm617_vm6, %v2917_v52, %v2918_v31  ;;  %v2070_v31 = vsub.s32 2, %v3413_v39 }
 0x3be   : > { %v2926_v4 = vpop.permute.xlu0 %2925 }
 0x3bf   : > { %v1291_v57 = vsel %vm617_vm6, %v2922_v55, %v2923_v54  ;;  %v2928_v1 = vunpack.i.h.bf16 %v2926_v4  ;;  %v2927_v2 = vunpack.i.l.bf16 %v2926_v4 }
 0x3c0   : > { %v1295_v58 = vpack.c.bf16 %v1291_v57, %v1290_v56  ;;  %v2931_v61 = vpop.permute.xlu1 %2930  ;;  %v2053_v57 = vld [vmem:[%s3605_s9 + $0x8] sm:$0x77] }
 0x3c1   : > { %v2933_v63 = vunpack.i.h.bf16 %v2931_v61  ;;  %v2932_v0 = vunpack.i.l.bf16 %v2931_v61  ;;  %v1453_v24 = vsel %vm617_vm6, %v2927_v2, %v2928_v1 }
 0x3c2   : > { %2765 = vmatmul.mubr.msk.bf16.vlgmr.msra.gmra.mrb[0].mxu0 %vm742_vm5, %v1295_v58 }
 0x3c3   : > { %2769 = vmatpush3.bf16.msra.mxu0 %v2973_v29  ;;  %2778 = vmatprep.mubr.msk.bf16.mxu0 %vm742_vm5, %v1457_v48  ;;  %v1454_v5 = vsel %vm617_vm6, %v2932_v0, %v2933_v63  ;;  %v2049_v29 = vld [vmem:[%s469_s16 + $0x8] sm:$0x77]  ;;  %v2058_v48 = vld [vmem:[%s3606_s10] sm:$0xf]  ;;  %v3454_v0 = vadd.f32 %v2053_v57, %v3382_v11 }
 0x3c4   : > { %2770 = vmatprep.subr.bf16.mxu0 %v2974_v59  ;;  %v1458_v32 = vpack.c.bf16 %v1454_v5, %v1453_v24  ;;  %2371 = vst [vmem:[%s3387_s19] sm:$0x33] %v2619_v20  ;;  %2372 = vst [vmem:[%s3387_s19 + $0x8] sm:$0x33] %v2620_v21  ;;  %v2067_v28 = vrot.slane %v2058_v48, %v3421_v46  ;;  %v2071_v54 = vrot.slane %v2058_v48, %v2070_v31  ;;  %v1748_v31 = vld [vmem:[%s3603_s7 + $0x10] sm:$0xff] }
 0x3c5   : > { %2373 = vst [vmem:[%s3387_s19 + $0x10] sm:$0x33] %v2621_v22  ;;  %2374 = vst [vmem:[%s3387_s19 + $0x18] sm:$0x33] %v2622_v30 }
 0x3c7   : > { %2771 = vmatpush3.bf16.msra.mxu0 %v2974_v59 }
 0x3c8   : > { %2772 = vmatprep.subr.bf16.mxu0 %v2975_v51 }
 0x3cb   : > { %2773 = vmatpush3.bf16.msra.mxu0 %v2975_v51  ;;  %v3447_v51 = vadd.f32 %v2053_v57, %v2049_v29 }
 0x3cc   : > { %2774 = vmatprep.subr.bf16.mxu0 %v2976_v60 }
 0x3cf   : > { %2775 = vmatpush3.bf16.msra.mxu0 %v2976_v60 }
 0x3d0   : > { %2853 = vmatprep.subr.msk.bf16.mxu0 %vm496_vm0, %v2977_v62 }
 0x3d3   : > { %2777 = vmatpush3.bf16.msra.mxu0 %v1503_v3 }
 0x3d4   : > { %2782 = vmatprep.subr.bf16.mxu0 %v2978_v23 }
 0x3d6   : > { %2779 = vmatmul.mubr.msk.bf16.vlgmr.msra.gmra.mrb[0].mxu0 %vm742_vm5, %v1458_v32 }
 0x3d7   : > { %2783 = vmatpush3.bf16.msra.mxu0 %v2978_v23 }
 0x3d8   : > { %2784 = vmatprep.subr.bf16.mxu0 %v2979_v33 }
 0x3db   : > { %2785 = vmatpush3.bf16.msra.mxu0 %v2979_v33 }
 0x3dc   : > { %2786 = vmatprep.subr.bf16.mxu0 %v2980_v34 }
 0x3df   : > { %2787 = vmatpush3.bf16.msra.mxu0 %v2980_v34 }
 0x3e0   : > { %2788 = vmatprep.subr.bf16.mxu0 %v2981_v35 }
 0x3e3   : > { %2789 = vmatpush3.bf16.msra.mxu0 %v2981_v35 }
 0x3e4   : > { %2854 = vmatprep.subr.msk.bf16.mxu0 %vm496_vm0, %v2982_v37  ;;  %vm2037_vm0 = vcmask 785408  }
 0x3e7   : > { %2791 = vmatpush3.bf16.msra.mxu0 %v1668_v38 }
 0x425   : > { %v1593_v40 = vpop.f32.mrb[28].mxu1 }
 0x426   : > { %v1602_v41 = vsub.f32 %v1593_v40, %v3272_v42  ;;  %v1595_v43 = vpop.f32.mrb[29].mxu1 }
 0x427   : > { %v1603_v6 = vsub.f32 %v1595_v43, %v3275_v8  ;;  %v1597_v7 = vpop.f32.mrb[30].mxu1  ;;  %v2063_v8 = vrot.slane %v2058_v48, %v3418_v45 }
 0x428   : > { %v1604_v47 = vsub.f32 %v1597_v7, %v3279_v44  ;;  %v1599_v26 = vpop.f32.mrb[31].mxu1  ;;  %v2052_v44 = vld [vmem:[%s3605_s9] sm:$0x77] }
 0x429   : > { %v2934_v27 = vpack.i.bf16 %v1603_v6, %v1602_v41  ;;  %v1605_v42 = vsub.f32 %v1599_v26, %v3284_v10  ;;  %v2074_v10 = vsub.s32 3, %v3413_v39  ;;  %v2076_v52 = vcombine.low %v2063_v8, %v2067_v28  ;;  %v1746_v8 = vld [vmem:[%s3603_s7] sm:$0xff]  ;;  %v1747_v28 = vld [vmem:[%s3603_s7 + $0x8] sm:$0xff] }
 0x42a   : > { %v1622_v49 = vpack.c.bf16 %v1604_v47, %v1602_v41  ;;  %v3438_v53 = vadd.f32 %v2052_v44, %v2048_v25  ;;  %v3445_v58 = vadd.f32 %v2052_v44, %v3380_v9  ;;  %v2122_v41 = vand.u32 127, %v1858_v36 }
 0x42b   : > { %v2939_v50 = vpack.i.bf16 %v1605_v42, %v1604_v47  ;;  %2935 = vrot.lane.b32.xlu0 %v2934_v27, %s3009_s26  ;;  %v2075_v55 = vrot.slane %v2058_v48, %v2074_v10  ;;  %v2816_v44 = vpack.c.bf16 %v1747_v28, %v1746_v8  ;;  %v1749_v10 = vld [vmem:[%s3603_s7 + $0x18] sm:$0xff] }
 0x42c   : > { %2792 = vmatprep.mubr.msk.bf16.mxu0 %vm742_vm5, %v1622_v49  ;;  %v2080_v56 = vmul.f32 %v2076_v52, %v3438_v53  ;;  %v2082_v61 = vmul.f32 %v2076_v52, %v3445_v58  ;;  %v3468_v7 = vsub.s32 %v2122_v41, %v3413_v39  ;;  %v2820_v52 = vpack.c.bf16 %v1749_v10, %v1748_v31 }
 0x42d   : > { %2940 = vrot.lane.b32.xlu1 %v2939_v50, %s3009_s26  ;;  %v2077_v59 = vcombine.low %v2071_v54, %v2075_v55  ;;  %s2115_s26 = sld [smem:[#allocation2]]  ;;  %2817 = vmatprep.subr.bf16.mxu1 %v2816_v44 }
 0x42e   : > { %v2088_v60 = vcombine.high %v2080_v56, %v2080_v56  ;;  %v2097_v62 = vsel %vm2096_vm7, %v2080_v56, 0.0  ;;  %v2090_v1 = vcombine.high %v2082_v61, %v2082_v61  ;;  %v2106_v12 = vsel %vm2096_vm7, %v2082_v61, 0.0  ;;  %2819 = vmatpush3.bf16.msra.mxu1 %v2816_v44 }
 0x42f   : > { %v2081_v4 = vmul.f32 %v2077_v59, %v3447_v51  ;;  %v2083_v9 = vmul.f32 %v2077_v59, %v3454_v0  ;;  %2821 = vmatprep.subr.bf16.mxu1 %v2820_v52 }
 0x430   : > { %v2098_v63 = vsel %vm2096_vm7, %v2088_v60, 0.0  ;;  %v2107_v13 = vsel %vm2096_vm7, %v2090_v1, 0.0 }
 0x431   : > { %v2099_v2 = vadd.f32 %v2098_v63, %v2097_v62  ;;  %v2089_v3 = vcombine.high %v2081_v4, %v2081_v4  ;;  %v2100_v5 = vsel %vm2096_vm7, %v2081_v4, 0.0  ;;  %v2108_v20 = vadd.f32 %v2107_v13, %v2106_v12  ;;  %v2614_v62 = vld [vmem:[%s3602_s6] ss:$0 sm:$0xff] }
 0x432   : > { %v2091_v21 = vcombine.high %v2083_v9, %v2083_v9  ;;  %v2109_v22 = vsel %vm2096_vm7, %v2083_v9, 0.0  ;;  %2823 = vmatpush3.bf16.msra.mxu1 %v2820_v52 }
 0x433   : > { %v2101_v14 = vadd.f32 %v2100_v5, %v2099_v2  ;;  %v2102_v19 = vsel %vm2096_vm7, %v2089_v3, 0.0  ;;  %v2110_v23 = vadd.f32 %v2109_v22, %v2108_v20  ;;  %v2116_v43 = vstv %s2115_s26  ;;  %s3013_s26 = smov 64  }
 0x434   : > { %v2111_v24 = vsel %vm2096_vm7, %v2091_v21, 0.0 }
 0x435   : > { %v2103_v11 = vadd.f32 %v2102_v19, %v2101_v14  ;;  %v2112_v25 = vadd.f32 %v2111_v24, %v2110_v23 }
 0x44a   : > { %2104 = vadd.xlane.f32.xlu0 %v2103_v11 }
 0x451   : > { %2113 = vadd.xlane.f32.xlu1 %v2112_v25 }
 0x49d   : > { %v2936_v29 = vpop.permute.xlu0 %2935 }
 0x49e   : > { %v2938_v30 = vunpack.i.h.bf16 %v2936_v29  ;;  %v2937_v32 = vunpack.i.l.bf16 %v2936_v29 }
 0x49f   : > { %v2941_v33 = vpop.permute.xlu1 %2940 }
 0x4a0   : > { %v2943_v34 = vunpack.i.h.bf16 %v2941_v33  ;;  %v2942_v35 = vunpack.i.l.bf16 %v2941_v33  ;;  %v1618_v37 = vsel %vm617_vm6, %v2937_v32, %v2938_v30 }
 0x4a2   : > { %v1619_v38 = vsel %vm617_vm6, %v2942_v35, %v2943_v34 }
 0x4a3   : > { %v1623_v40 = vpack.c.bf16 %v1619_v38, %v1618_v37  ;;  %v3010_v37 = vmov 1983009808  }
 0x4a4   : > { %v1856_v38 = vunpack.c.l.s4 %v3010_v37 }
 0x4a5   : > { %2793 = vmatmul.mubr.msk.bf16.vlgmr.msra.gmra.mrb[0].mxu0 %vm742_vm5, %v1623_v40  ;;  %v1849_v40 = vld [vmem:[%s3604_s8 + $0x8] sm:$0xff] }
 0x4a6   : > { %v1857_v41 = vunpack.c.0.s8 %v1856_v38 }
 0x4d7   : > { %v2105_v6 = vpop.xlane.xlu0 %2104 }
 0x4d8   : > { %v2117_v47 = vadd.f32 %v2116_v43, %v2105_v6  ;;  %v3011_v6 = vmov 1934713408  }
 0x4da   : > { %v2126_v27 = vrot.slane %v2117_v47, %v3468_v7 }
 0x4de   : > { %v2114_v26 = vpop.xlane.xlu1 %2113 }
 0x4df   : > { %v2118_v48 = vadd.f32 %v2116_v43, %v2114_v26  ;;  %v1848_v43 = vld [vmem:[%s3604_s8] sm:$0xff] }
 0x4e1   : > { %v2130_v42 = vrot.slane %v2118_v48, %v3468_v7 }
 0x4e3   : > { %v2132_v49 = vsel %vm2131_vm8, %v2130_v42, %v2126_v27  ;;  %v1860_v42 = vsub.s32 %v1857_v41, %v3413_v39 }
 0x4e4   : > { %v2135_v50 = vsel %vm2134_vm9, %v2132_v49, -inf  ;;  %v3012_v49 = vmov 0.0  }
 0x4e5   : > { %2136 = vmax.xlane.f32.xlu0 %v2135_v50 }
 0x572   : > { %v2137_v54 = vpop.xlane.xlu0 %2136 }
 0x573   : > { %v2142_v55 = vrot.slane %v2137_v54, %v3418_v45  ;;  %v2146_v56 = vrot.slane %v2137_v54, %v3421_v46 }
 0x575   : > { %v2149_v57 = vsub.f32 %v2117_v47, %v2142_v55  ;;  %v2150_v59 = vsub.f32 %v2118_v48, %v2146_v56  ;;  %v1887_v47 = vunpack.c.l.s4 %v3011_v6 }
 0x577   : > { %v2151_v60 = vmul.f32 1.442695, %v2149_v57  ;;  %v2153_v61 = vmul.f32 1.442695, %v2150_v59  ;;  %v1888_v8 = vunpack.c.0.s8 %v1887_v47 }
 0x578   : > { %v2794_v4 = vpop.f32.mrb[0].mxu0 }
 0x579   : > { %2991 = vpow2.f32 %v2151_v60  ;;  %v2824_v63 = vadd.f32 %v2794_v4, %v3251_v15  ;;  %v1704_v1 = vpop.f32.mrb[1].mxu0  ;;  %v1891_v59 = vsub.s32 %v1888_v8, %v3413_v39 }
 0x57a   : > { %2993 = vpow2.f32 %v2153_v61  ;;  %v2825_v2 = vadd.f32 %v1704_v1, %v3253_v16  ;;  %v2795_v3 = vpop.f32.mrb[2].mxu0 }
 0x57b   : > { %v1732_v5 = vadd.f32 %v2824_v63, %v2614_v62  ;;  %v2826_v9 = vadd.f32 %v2795_v3, %v3255_v17  ;;  %v1707_v12 = vpop.f32.mrb[3].mxu0 }
 0x57c   : > { %v1730_v13 = vadd.f32 %v2825_v2, %v2614_v62  ;;  %v2827_v14 = vadd.f32 %v1707_v12, %v3257_v18 }
 0x57d   : > { %v1733_v20 = vadd.f32 %v2826_v9, %v2614_v62  ;;  %v1740_v22 = vmul.f32 0.01, %v1732_v5  ;;  %vm1736_vm13 = vcmp.gt.f32.partialorder %v1732_v5, 0.0 }
 0x57e   : > { %v1738_v19 = vmul.f32 0.01, %v1730_v13  ;;  %v1731_v21 = vadd.f32 %v2827_v14, %v2614_v62  ;;  %vm1734_vm11 = vcmp.gt.f32.partialorder %v1730_v13, 0.0 }
 0x57f   : > { %v1741_v16 = vmul.f32 0.01, %v1733_v20  ;;  %v1744_v17 = vsel %vm1736_vm13, %v1732_v5, %v1740_v22  ;;  %vm1737_vm14 = vcmp.gt.f32.partialorder %v1733_v20, 0.0 }
 0x580   : > { %vm1735_vm12 = vcmp.gt.f32.partialorder %v1731_v21, 0.0  ;;  %v1739_v15 = vmul.f32 0.01, %v1731_v21  ;;  %v1742_v11 = vsel %vm1734_vm11, %v1730_v13, %v1738_v19 }
 0x581   : > { %2804 = vmatprep.mubr.msk.f32.mxu1 %vm1750_vm10, %v1742_v11  ;;  %v1745_v25 = vsel %vm1737_vm14, %v1733_v20, %v1741_v16 }
 0x582   : > { %v1743_v23 = vsel %vm1735_vm12, %v1731_v21, %v1739_v15 }
 0x583   : > { %v3496_v24 = vpop.eup %2991  ;;  %2805 = vmatmul.mubr.msk.f32.vlgmr.msra.gmra.mrb[2].mxu1 %vm1750_vm10, %v1743_v23 }
 0x584   : > { %v3499_v18 = vpop.eup %2993  ;;  %2158 = vperm.xlu0 %2944, %v3496_v24   ;;  %2807 = vmatprep.mubr.msk.f32.mxu1 %vm1750_vm10, %v1744_v17 }
 0x585   : > { %2161 = vperm.xlu1 %2945, %v3499_v18  }
 0x587   : > { %2808 = vmatmul.mubr.msk.f32.gmra.mrb[32].mxu1 %vm1750_vm10, %v1745_v25 }
 0x603   : > { %v2159_v29 = vpop.permute.xlu0 %2158 }
 0x604   : > { %v2162_v30 = vpop.permute.xlu1 %2161  ;;  %v2166_v32 = vrot.slane %v2159_v29, %v3468_v7 }
 0x605   : > { %v2170_v33 = vrot.slane %v2162_v30, %v3468_v7 }
 0x607   : > { %v2171_v34 = vsel %vm2131_vm8, %v2170_v33, %v2166_v32 }
 0x608   : > { %v2173_v35 = vsel %vm2134_vm9, %v2171_v34, 0.0 }
 0x609   : > { %2174 = vadd.xlane.f32.xlu1 %v2173_v35 }
 0x656   : > { %v2806_v26 = vpop.f32.mrb[2].mxu1 }
 0x657   : > { %v1851_v7 = vadd.f32 %v2806_v26, %v1849_v40  ;;  %v1829_v48 = vpop.f32.mrb[3].mxu1 }
 0x658   : > { %v1850_v27 = vadd.f32 %v1848_v43, %v1829_v48 }
 0x659   : > { %v1920_v50 = vcombine.high %v1851_v7, %v3012_v49  ;;  %v1927_v55 = vrot.slane %v1851_v7, %v1860_v42 }
 0x65a   : > { %v2809_v28 = vpop.f32.mrb[32].mxu1  ;;  %v1854_v52 = vcombine.high %v1850_v27, %v3012_v49  ;;  %v1861_v60 = vrot.slane %v1850_v27, %v1860_v42 }
 0x65b   : > { %v1934_v44 = vrot.slane %v1920_v50, %v1860_v42  ;;  %v1853_v31 = vadd.f32 %v2809_v28, %v1849_v40  ;;  %v1839_v10 = vpop.f32.mrb[33].mxu1 }
 0x65c   : > { %v1852_v54 = vadd.f32 %v1848_v43, %v1839_v10  ;;  %v1868_v2 = vrot.slane %v1854_v52, %v1860_v42 }
 0x65d   : > { %v1935_v56 = vcombine.high %v1853_v31, %v3012_v49  ;;  %v1942_v57 = vrot.slane %v1853_v31, %v1860_v42 }
 0x65e   : > { %v1869_v61 = vcombine.high %v1852_v54, %v3012_v49  ;;  %v1876_v4 = vrot.slane %v1852_v54, %v1860_v42 }
 0x65f   : > { %v1949_v62 = vrot.slane %v1935_v56, %v1860_v42  ;;  %v1950_v63 = vcombine.low %v1927_v55, %v1942_v57  ;;  %v1951_v1 = vcombine.high %v1927_v55, %v1942_v57 }
 0x660   : > { %v1883_v3 = vrot.slane %v1869_v61, %v1860_v42  ;;  %v1884_v5 = vcombine.low %v1861_v60, %v1876_v4  ;;  %v1885_v9 = vcombine.high %v1861_v60, %v1876_v4 }
 0x661   : > { %v1966_v12 = vcombine.low %v1934_v44, %v1949_v62  ;;  %v1965_v13 = vrot.slane %v1951_v1, %v1891_v59  ;;  %v3521_v14 = vrot.slane %v1950_v63, %v1891_v59  ;;  %v1967_v19 = vcombine.high %v1934_v44, %v1949_v62 }
 0x662   : > { %v1900_v20 = vcombine.low %v1868_v2, %v1883_v3  ;;  %v1899_v21 = vrot.slane %v1885_v9, %v1891_v59  ;;  %v3523_v22 = vrot.slane %v1884_v5, %v1891_v59  ;;  %v1901_v15 = vcombine.high %v1868_v2, %v1883_v3 }
 0x663   : > { %2015 = vrot.lane.b32.xlu1 %v1965_v13, %s3013_s26  ;;  %v1981_v11 = vrot.slane %v1967_v19, %v1891_v59  ;;  %v3526_v16 = vrot.slane %v1966_v12, %v1891_v59  ;;  %v1983_v33 = vcombine.high %v1965_v13, %v3012_v49  ;;  %v1982_v6 = vcombine.high %v3521_v14, %v3012_v49 }
 0x664   : > { %v1917_v23 = vcombine.high %v1899_v21, %v3012_v49  ;;  %v1915_v17 = vrot.slane %v1901_v15, %v1891_v59  ;;  %v3529_v25 = vrot.slane %v1900_v20, %v1891_v59 }
 0x665   : > { %v1985_v29 = vcombine.high %v1981_v11, %v3012_v49 }
 0x666   : > { %v1919_v30 = vcombine.high %v1915_v17, %v3012_v49  ;;  %v1918_v32 = vcombine.high %v3529_v25, %v3012_v49 }
 0x667   : > { %1995 = vrot.lane.b32.xlu1 %v1917_v23, %s3014_s23 }
 0x66b   : > { %1999 = vrot.lane.b32.xlu1 %v1918_v32, %s3015_s24 }
 0x66f   : > { %2019 = vrot.lane.b32.xlu1 %v1983_v33, %s3014_s23 }
 0x696   : > { %v2175_v34 = vpop.xlane.xlu1 %2174 }
 0x697   : > { %v2180_v35 = vrot.slane %v2175_v34, %v3418_v45  ;;  %v2184_v37 = vrot.slane %v2175_v34, %v3421_v46  ;;  %v1916_v45 = vcombine.high %v3523_v22, %v3012_v49  ;;  %v1984_v46 = vcombine.high %v3526_v16, %v3012_v49 }
 0x699   : > { %2995 = vrcp.f32 %v2180_v35 }
 0x69a   : > { %2997 = vrcp.f32 %v2184_v37 }
 0x6a3   : > { %v2996_v38 = vpop.eup %2995 }
 0x6a4   : > { %v2188_v40 = vmul.f32 %v2996_v38, %v3496_v24  ;;  %v2998_v41 = vpop.eup %2997  ;;  %v3016_v24 = vmov 839922192  }
 0x6a5   : > { %v2190_v43 = vmul.f32 %v2998_v41, %v3499_v18  ;;  %v2200_v18 = vunpack.c.l.s4 %v3016_v24 }
 0x6a6   : > { %2193 = vperm.xlu0 %2944, %v2188_v40  }
 0x6a7   : > { %v2201_v47 = vunpack.c.0.s8 %v2200_v18 }
 0x6a9   : > { %v2204_v26 = vsub.s32 %v2201_v47, %v3413_v39 }
 0x6aa   : > { %2197 = vperm.xlu0 %2944, %v2190_v43  }
 0x6ae   : > { %1991 = vrot.lane.b32.xlu0 %v1899_v21, %s3013_s26 }
 0x6b2   : > { %2011 = vrot.lane.b32.xlu0 %v1982_v6, %s3015_s24 }
 0x6b6   : > { %2027 = vrot.lane.b32.xlu0 %v1981_v11, %s3013_s26 }
 0x6ba   : > { %1987 = vrot.lane.b32.xlu0 %v1916_v45, %s3015_s24 }
 0x6be   : > { %2003 = vrot.lane.b32.xlu0 %v1915_v17, %s3013_s26 }
 0x6c2   : > { %2023 = vrot.lane.b32.xlu0 %v1984_v46, %s3015_s24 }
 0x6c6   : > { %2007 = vrot.lane.b32.xlu0 %v1919_v30, %s3014_s23 }
 0x6ca   : > { %2031 = vrot.lane.b32.xlu0 %v1985_v29, %s3014_s23 }
 0x6d5   : > { %v2016_v9 = vpop.permute.xlu1 %2015 }
 0x6d9   : > { %v1996_v40 = vpop.permute.xlu1 %1995 }
 0x725   : > { %v2194_v7 = vpop.permute.xlu0 %2193 }
 0x726   : > { %v2205_v48 = vrot.slane %v2194_v7, %v2204_v26 }
 0x728   : > { %v2215_v27 = vmul.f32 %v2205_v48, %v3438_v53  ;;  %v2216_v42 = vmul.f32 %v2205_v48, %v3447_v51 }
 0x729   : > { %v2198_v50 = vpop.permute.xlu0 %2197 }
 0x72a   : > { %v2223_v8 = vcombine.high %v2215_v27, %v2215_v27  ;;  %v2224_v28 = vcombine.high %v2216_v42, %v2216_v42  ;;  %v2212_v44 = vrot.slane %v2198_v50, %v2204_v26  ;;  %v2231_v49 = vsel %vm2096_vm7, %v2215_v27, 0.0  ;;  %v2000_v50 = vpop.permute.xlu1 %1999 }
 0x72b   : > { %v2245_v52 = vsel %vm2096_vm7, %v2216_v42, 0.0  ;;  %v2232_v56 = vrot.slane %v2231_v49, 4 }
 0x72c   : > { %v2238_v31 = vsel %vm2096_vm7, %v2223_v8, 0.0  ;;  %v2217_v54 = vmul.f32 %v2212_v44, %v3445_v58  ;;  %v2218_v55 = vmul.f32 %v2212_v44, %v3454_v0  ;;  %v2252_v53 = vsel %vm2096_vm7, %v2224_v28, 0.0 }
 0x72d   : > { %v1992_v10 = vpop.permute.xlu0 %1991  ;;  %v2239_v57 = vrot.slane %v2238_v31, 4  ;;  %v2246_v4 = vrot.slane %v2245_v52, 4  ;;  %v2233_v3 = vadd.f32 %v2232_v56, %v2231_v49  ;;  %v2253_v5 = vrot.slane %v2252_v53, 4 }
 0x72e   : > { %v2225_v51 = vcombine.high %v2217_v54, %v2217_v54  ;;  %v2226_v59 = vcombine.high %v2218_v55, %v2218_v55  ;;  %v2259_v60 = vsel %vm2096_vm7, %v2217_v54, 0.0  ;;  %v2273_v61 = vsel %vm2096_vm7, %v2218_v55, 0.0 }
 0x72f   : > { %v2260_v63 = vrot.slane %v2259_v60, 4  ;;  %v2274_v2 = vrot.slane %v2273_v61, 4  ;;  %v2240_v0 = vadd.f32 %v2239_v57, %v2238_v31  ;;  %v2247_v21 = vadd.f32 %v2246_v4, %v2245_v52 }
 0x730   : > { %v2266_v1 = vsel %vm2096_vm7, %v2225_v51, 0.0  ;;  %v2280_v58 = vsel %vm2096_vm7, %v2226_v59, 0.0  ;;  %v2234_v29 = vrot.slane %v2233_v3, 2  ;;  %v2254_v32 = vadd.f32 %v2253_v5, %v2252_v53 }
 0x731   : > { %v2012_v62 = vpop.permute.xlu0 %2011  ;;  %v2261_v12 = vadd.f32 %v2260_v63, %v2259_v60  ;;  %v2267_v13 = vrot.slane %v2266_v1, 4  ;;  %v2275_v19 = vadd.f32 %v2274_v2, %v2273_v61  ;;  %v2281_v20 = vrot.slane %v2280_v58, 4 }
 0x732   : > { %v2241_v30 = vrot.slane %v2240_v0, 2  ;;  %v2248_v35 = vrot.slane %v2247_v21, 2  ;;  %v2235_v6 = vadd.f32 %v2234_v29, %v2233_v3  ;;  %v2255_v46 = vrot.slane %v2254_v32, 2 }
 0x733   : > { %v2262_v11 = vrot.slane %v2261_v12, 2  ;;  %v2268_v23 = vadd.f32 %v2267_v13, %v2266_v1  ;;  %v2282_v17 = vadd.f32 %v2281_v20, %v2280_v58  ;;  %v2276_v34 = vrot.slane %v2275_v19, 2  ;;  %v2020_v20 = vpop.permute.xlu1 %2019 }
 0x734   : > { %v2242_v45 = vadd.f32 %v2241_v30, %v2240_v0  ;;  %v2249_v18 = vadd.f32 %v2248_v35, %v2247_v21  ;;  %v2236_v27 = vrot.slane %v2235_v6, 1  ;;  %v2256_v8 = vadd.f32 %v2255_v46, %v2254_v32 }
 0x735   : > { %v3562_v15 = vpop.permute.xlu0 %2027  ;;  %v2269_v33 = vrot.slane %v2268_v23, 2  ;;  %v2263_v37 = vadd.f32 %v2262_v11, %v2261_v12  ;;  %v2283_v43 = vrot.slane %v2282_v17, 2  ;;  %v2277_v24 = vadd.f32 %v2276_v34, %v2275_v19 }
 0x736   : > { %v2243_v44 = vrot.slane %v2242_v45, 1  ;;  %v2250_v49 = vrot.slane %v2249_v18, 1  ;;  %v2039_v57 = vsel %vm1750_vm10, %v3529_v25, %v2000_v50  ;;  %v2237_v53 = vadd.f32 %v2236_v27, %v2235_v6 }
 0x737   : > { %v2270_v41 = vadd.f32 %v2269_v33, %v2268_v23  ;;  %v2264_v47 = vrot.slane %v2263_v37, 1  ;;  %v2284_v7 = vadd.f32 %v2283_v43, %v2282_v17  ;;  %v2278_v28 = vrot.slane %v2277_v24, 1 }
 0x738   : > { %v3017_v51 = vmov 1966171168   ;;  %v2042_v60 = vsel %vm1750_vm10, %v3521_v14, %v2012_v62  ;;  %v2244_v61 = vadd.f32 %v2243_v44, %v2242_v45  ;;  %v2257_v4 = vrot.slane %v2256_v8, 1 }
 0x739   : > { %v1988_v38 = vpop.permute.xlu0 %1987  ;;  %v2271_v48 = vrot.slane %v2270_v41, 1  ;;  %v2265_v31 = vadd.f32 %v2264_v47, %v2263_v37  ;;  %v2285_v56 = vrot.slane %v2284_v7, 1  ;;  %v2314_v59 = vunpack.c.l.s4 %v3017_v51 }
 0x73a   : > { %v2034_v42 = vsel %vm1750_vm10, %v3523_v22, %v1988_v38  ;;  %v2279_v22 = vadd.f32 %v2278_v28, %v2277_v24  ;;  %v2251_v63 = vadd.f32 %v2250_v49, %v2249_v18  ;;  %v2043_v14 = vsel %vm2035_vm15, %v2042_v60, %v2016_v9 }
 0x73b   : > { %v2036_v54 = vsel %vm2035_vm15, %v2034_v42, %v1992_v10  ;;  %v2272_v55 = vadd.f32 %v2271_v48, %v2270_v41  ;;  %v2295_v2 = vsel %vm2131_vm8, %v2265_v31, %v2237_v53  ;;  %v2286_v5 = vadd.f32 %v2285_v56, %v2284_v7 }
 0x73c   : > { %v2038_v10 = vsel %vm2037_vm0, %v2036_v54, %v1996_v40  ;;  %v2315_v62 = vunpack.c.0.s8 %v2314_v59  ;;  %v2258_v13 = vadd.f32 %v2257_v4, %v2256_v8  ;;  %v2297_v19 = vsel %vm2131_vm8, %v2279_v22, %v2251_v63 }
 0x73d   : > { %v2004_v26 = vpop.permute.xlu0 %2003  ;;  %v2296_v3 = vsel %vm2131_vm8, %v2272_v55, %v2244_v61  ;;  %v2303_v21 = vadd.f32 %v2295_v2, %v2038_v10  ;;  %v2044_v17 = vsel %vm2037_vm0, %v2043_v14, %v2020_v20 }
 0x73e   : > { %v2040_v1 = vsel %vm2035_vm15, %v2039_v57, %v2004_v26  ;;  %v2318_v9 = vsub.s32 %v2315_v62, %v3413_v39  ;;  %v2305_v32 = vadd.f32 %v2297_v19, %v2044_v17 }
 0x741   : > { %v2024_v52 = vpop.permute.xlu0 %2023 }
 0x742   : > { %v2045_v25 = vsel %vm1750_vm10, %v3526_v16, %v2024_v52  ;;  %v2298_v16 = vsel %vm2131_vm8, %v2286_v5, %v2258_v13 }
 0x743   : > { %v2046_v11 = vsel %vm2035_vm15, %v2045_v25, %v3562_v15 }
 0x745   : > { %v2008_v58 = vpop.permute.xlu0 %2007 }
 0x746   : > { %v2041_v0 = vsel %vm2037_vm0, %v2040_v1, %v2008_v58 }
 0x747   : > { %v2304_v12 = vadd.f32 %v2296_v3, %v2041_v0 }
 0x749   : > { %v2032_v23 = vpop.permute.xlu0 %2031  ;;  %v2311_v30 = vcombine.low %v2303_v21, %v2304_v12 }
 0x74a   : > { %v2047_v29 = vsel %vm2037_vm0, %v2046_v11, %v2032_v23 }
 0x74b   : > { %v2306_v33 = vadd.f32 %v2298_v16, %v2047_v29  ;;  %v2319_v35 = vrot.slane %v2311_v30, %v2318_v9 }
 0x74d   : > { %v2312_v34 = vcombine.low %v2305_v32, %v2306_v33 }
 0x74f   : > { %v2326_v37 = vrot.slane %v2312_v34, %v2318_v9 }
 0x751   : > { %v2327_v38 = vcombine.low %v2319_v35, %v2326_v37  ;;  %v2328_v15 = vcombine.high %v2319_v35, %v2326_v37 }
 0x753   : > { %v2335_v40 = vrot.slane %v2327_v38, %v2318_v9  ;;  %v2342_v41 = vrot.slane %v2328_v15, %v2318_v9 }
 0x755   : > { %2349 = vst.msk [vmem:[%s475_s30] sm:$0xf] %vm2347_vm1, %v2335_v40  ;;  %2623 = vst.msk [vmem:[%s3387_s19 + $0x2] ss:$4 sm:$0xf] %vm2347_vm1, %v2335_v40 }
 0x756   : > { %2350 = vst.msk [vmem:[%s475_s30 + $0x4] sm:$0xf] %vm2347_vm1, %v2342_v41  ;;  %2624 = vst.msk [vmem:[%s3387_s19 + $0x12] ss:$4 sm:$0xf] %vm2347_vm1, %v2342_v41 }
 0x757 PF: > { %s25_s27 = sadd.s32 1, %s3005_s27  }
 0x758   : > { %p22_p5 = scmp.ge.s32.totalorder %s25_s27, 4  }
 0x75a   :  { %24 = sbr.rel (!%p22_p5) target bundleno = 2 (0x2), region = 122 }

</bundles_post_ra>
